<compile_context>
chip_gen: v7x
topology: tpu7x:2x2x1
jax: 0.10.0
libtpu: 0.0.40
codegen_flags: <defaults>
</compile_context>

<pallas_src>
import math
import functools

import jax
import jax.numpy as jnp
from jax.experimental import pallas as pl
from jax.experimental.pallas import tpu as pltpu

F32 = jnp.float32
BF16 = jnp.bfloat16


# ------------------------------ in-kernel math ------------------------------

def _erf(x):
    # Abramowitz & Stegun 7.1.26 rational approximation, |err| <= 1.5e-7 (f32-exact).
    a1, a2, a3, a4, a5 = 0.254829592, -0.284496736, 1.421413741, -1.453152027, 1.061405429
    p = 0.3275911
    ax = jnp.abs(x)
    t = 1.0 / (1.0 + p * ax)
    poly = ((((a5 * t + a4) * t + a3) * t + a2) * t + a1) * t
    y = 1.0 - poly * jnp.exp(-ax * ax)
    return jnp.where(x >= 0, y, -y)


def _gelu_exact(x):
    # HF BERT "gelu" (erf-based, not tanh approximation)
    return 0.5 * x * (1.0 + _erf(x * (1.0 / math.sqrt(2.0))))


def _layernorm(h, g, b, eps=1e-12):
    mu = jnp.mean(h, axis=-1, keepdims=True)
    var = jnp.mean((h - mu) ** 2, axis=-1, keepdims=True)
    return (h - mu) * jax.lax.rsqrt(var + eps) * g + b


# ----------------------------- fused layer kernel ----------------------------

def fused_layer_kernel(*refs, nh, dh, bb, apply_embed, emit_proj, normalize):
    """One fused post-LN BERT encoder layer for `bb` batch elements.

    Optionally fuses BertEmbeddings (first layer) and text_proj + L2-normalize on the
    CLS row (last layer) into the same kernel.
    """
    n_in = 2 + (4 if apply_embed else 0) + 12 + (2 if emit_proj else 0)
    assert len(refs) == n_in + 1
    refs = list(refs)
    i = 0
    x_ref, mask_ref = refs[0], refs[1]
    i = 2
    if apply_embed:
        pos_ref, typ_ref, eg_ref, eb_ref = refs[i:i + 4]
        i += 4
    (wqkv_ref, bqkv_ref, wo_ref, bo_ref,
     ln1g_ref, ln1b_ref, w1_ref, b1_ref,
     w2_ref, b2_ref, ln2g_ref, ln2b_ref) = refs[i:i + 12]
    i += 12
    if emit_proj:
        pw_ref, pb_ref = refs[i:i + 2]
        i += 2
    o_ref = refs[i]

    H = nh * dh
    L = x_ref.shape[1]
    scale = 1.0 / math.sqrt(dh)

    # ---- load residual stream (bf16 in HBM), optionally apply BertEmbeddings
    x_bf = x_ref[...]                                # (bb, L, H) bf16
    xf = x_bf.astype(F32)
    if apply_embed:
        xf = xf + pos_ref[...][None, :, :] + typ_ref[...][None, :, :]
        xf = _layernorm(xf, eg_ref[...], eb_ref[...])
        x_bf = xf.astype(BF16)

    x2 = xf.reshape(bb * L, H)                       # f32 residual (bb*L, H)

    # ---- fused QKV projection over all bb*L rows (bf16 MXU, f32 accumulation)
    qkv = jnp.dot(x_bf.reshape(bb * L, H), wqkv_ref[...],
                  preferred_element_type=F32) + bqkv_ref[...]            # (bb*L, 3H)

    # cast q/k/v to bf16 once; fold 1/sqrt(dh) into q (f32) before the cast
    q_bf = (qkv[:, 0 * H:1 * H] * scale).astype(BF16)
    k_bf = qkv[:, 1 * H:2 * H].astype(BF16)
    v_bf = qkv[:, 2 * H:3 * H].astype(BF16)
    wo = wo_ref[...]                                 # (H, H) bf16

    # ---- per-element, per-head attention; output projection accumulated per head
    # NOTE: a fully-masked row would give a uniform distribution (not NaN) -- same as HF BERT.
    attn_parts = []
    for b in range(bb):
        r0 = b * L
        add_mask = mask_ref[b]                       # (1, L) additive mask (0 or -1e4)
        k_b = k_bf[r0:r0 + L]                        # (L, H)
        v_b = v_bf[r0:r0 + L]
        # For the CLS-only epilogue layer only the query at position 0 is needed.
        q_b = q_bf[r0:r0 + 1] if emit_proj else q_bf[r0:r0 + L]
        acc = None
        for hd in range(nh):
            lo = hd * dh
            s = jax.lax.dot_general(
                q_b[:, lo:lo + dh], k_b[:, lo:lo + dh],
                dimension_numbers=(((1,), (1,)), ((), ())),
                preferred_element_type=F32) + add_mask                   # (nq, L)
            s = s - jnp.max(s, axis=-1, keepdims=True)
            p = jnp.exp(s)
            # approx reciprocal (EUP slot): ~2^-12 relative error in the softmax denom.
            p = p * pl.reciprocal(jnp.sum(p, axis=-1, keepdims=True), approx=True)
            ctx = jnp.dot(p.astype(BF16), v_b[:, lo:lo + dh],
                          preferred_element_type=F32)                    # (nq, dh)
            part = jnp.dot(ctx.astype(BF16), wo[lo:lo + dh, :],
                           preferred_element_type=F32)                   # (nq, H)
            acc = part if acc is None else acc + part
        attn_parts.append(acc)
    attn = attn_parts[0] if bb == 1 else jnp.concatenate(attn_parts, axis=0)
    attn = attn + bo_ref[...]

    # ---- residual + LayerNorm (CLS rows only for the fused-projection last layer)
    x_res = xf[:, 0, :] if emit_proj else x2
    h1 = _layernorm(attn + x_res, ln1g_ref[...], ln1b_ref[...])

    # ---- FFN with in-kernel erf-GELU + residual + LayerNorm
    f = jnp.dot(h1.astype(BF16), w1_ref[...], preferred_element_type=F32) + b1_ref[...]
    f = _gelu_exact(f)
    f = jnp.dot(f.astype(BF16), w2_ref[...], preferred_element_type=F32) + b2_ref[...]
    h2 = _layernorm(f + h1, ln2g_ref[...], ln2b_ref[...])

    if emit_proj:
        # text_proj on CLS + optional exact L2 normalize (f32, eps=1e-12)
        y = jnp.dot(h2.astype(BF16), pw_ref[...],
                    preferred_element_type=F32) + pb_ref[...]            # (bb, P)
        if normalize:
            nrm = jnp.sqrt(jnp.sum(y * y, axis=-1, keepdims=True))
            y = y * pl.reciprocal(jnp.maximum(nrm, 1e-12))               # exact reciprocal
        o_ref[...] = y.reshape(bb, 1, y.shape[-1])
    else:
        # bf16 residual stream between layers (halves HBM traffic)
        o_ref[...] = h2.reshape(bb, L, H).astype(BF16)


# --------------------------- pallas_call wrapper ----------------------------

def _const_spec(w):
    # Grid-invariant operand: block == full array, constant index map, single buffer
    # (no double-buffering of weights -> VMEM headroom on v7x).
    return pl.BlockSpec(w.shape, lambda i: (0, 0), pipeline_mode=pl.Buffered(1))


def pallas_bert_layer(x, add_mask, lp, *, nh, dh, bb,
                      embed=None, proj=None, normalize=True):
    B, L, H = x.shape
    apply_embed = embed is not None
    emit_proj = proj is not None

    inputs = [x, add_mask]
    in_specs = [pl.BlockSpec((bb, L, H), lambda i: (i, 0, 0)),
                pl.BlockSpec((bb, 1, L), lambda i: (i, 0, 0))]
    if apply_embed:
        for w in embed:
            inputs.append(w)
            in_specs.append(_const_spec(w))
    weights = (lp["wqkv"], lp["bqkv"], lp["wo"], lp["bo"],
               lp["ln1_g"], lp["ln1_b"], lp["w1"], lp["b1"],
               lp["w2"], lp["b2"], lp["ln2_g"], lp["ln2_b"])
    for w in weights:
        inputs.append(w)
        in_specs.append(_const_spec(w))
    if emit_proj:
        for w in proj:
            inputs.append(w)
            in_specs.append(_const_spec(w))
        P = proj[0].shape[1]
        out_shape = jax.ShapeDtypeStruct((B, 1, P), F32)
        out_spec = pl.BlockSpec((bb, 1, P), lambda i: (i, 0, 0))
    else:
        out_shape = jax.ShapeDtypeStruct((B, L, H), BF16)
        out_spec = pl.BlockSpec((bb, L, H), lambda i: (i, 0, 0))

    return pl.pallas_call(
        functools.partial(fused_layer_kernel, nh=nh, dh=dh, bb=bb,
                          apply_embed=apply_embed, emit_proj=emit_proj,
                          normalize=normalize),
        out_shape=out_shape,
        grid=(B // bb,),
        in_specs=in_specs,
        out_specs=out_spec,
        compiler_params=pltpu.CompilerParams(
            dimension_semantics=("parallel",),
            vmem_limit_bytes=48 * 1024 * 1024),
    )(*inputs)


def _pick_bb(B, L, H, I):
    """Batch elements per grid step: aim for >=256 matmul rows per step, stay within a
    conservative VMEM activation budget, keep >=2 grid steps when B>=2 (v7x megacore)."""
    target = min(B, max(1, -(-256 // L)))
    row_bytes = 4 * (3 * H + I + 4 * H)          # rough f32 intermediate footprint per row
    cap = max(1, (24 << 20) // max(1, L * row_bytes))
    bb = max(1, min(target, cap))
    if B >= 2:
        while bb > 1 and B // bb < 2:
            bb -= 1
    while B % bb:
        bb -= 1
    return bb


# ------------------------------ model (glue) --------------------------------

def alpro_text_encoder(token_embds, token_mask, params, *, nh, output_with_norm=True):
    """Mirrors AlproTextEncoder.forward (inference-only; dropout is a no-op)."""
    B, L, H = token_embds.shape
    dh = H // nh
    I = params["layers"][0]["w1"].shape[1]
    bb = _pick_bb(B, L, H, I)

    # bf16 residual stream; all normalization / softmax math stays f32 inside kernels.
    h = token_embds.astype(BF16)
    # extended attention mask: (1 - m) * -10000, broadcast over heads/query inside the kernel
    add_mask = (1.0 - token_mask.astype(F32))[:, None, :] * -10000.0      # (B, 1, L)

    embed = (params["pos_emb"][:L], params["type_emb"],
             params["emb_ln_g"], params["emb_ln_b"])
    proj = (params["proj_w"], params["proj_b"])
    nlayers = len(params["layers"])
    for li, lp in enumerate(params["layers"]):
        h = pallas_bert_layer(
            h, add_mask, lp, nh=nh, dh=dh, bb=bb,
            embed=embed if li == 0 else None,
            proj=proj if li == nlayers - 1 else None,
            normalize=output_with_norm)
    # last layer emitted (B, 1, P) -> (B, P)
    return h.reshape(B, -1)


# ------------------------------ param init ----------------------------------

def init_params(key, *, H, I, P, num_layers, max_txt_len):
    def dense(k, din, dout):
        w = (0.02 * jax.random.normal(k, (din, dout), F32)).astype(BF16)
        return w, jnp.zeros((1, dout), F32)

    keys = jax.random.split(key, 3 + num_layers)
    params = {
        "pos_emb": 0.02 * jax.random.normal(keys[0], (max_txt_len, H), F32),
        "type_emb": 0.02 * jax.random.normal(keys[1], (1, H), F32),
        "emb_ln_g": jnp.ones((1, H), F32),
        "emb_ln_b": jnp.zeros((1, H), F32),
    }
    layers = []
    for i in range(num_layers):
        lk = jax.random.split(keys[2 + i], 6)
        wq, bq = dense(lk[0], H, H)
        wk, bk = dense(lk[1], H, H)
        wv, bv = dense(lk[2], H, H)
        wo, bo = dense(lk[3], H, H)
        w1, b1 = dense(lk[4], H, I)
        w2, b2 = dense(lk[5], I, H)
        layers.append(dict(
            wqkv=jnp.concatenate([wq, wk, wv], axis=1),   # (H, 3H) bf16
            bqkv=jnp.concatenate([bq, bk, bv], axis=1),   # (1, 3H) f32
            wo=wo, bo=bo, w1=w1, b1=b1, w2=w2, b2=b2,
            ln1_g=jnp.ones((1, H), F32), ln1_b=jnp.zeros((1, H), F32),
            ln2_g=jnp.ones((1, H), F32), ln2_b=jnp.zeros((1, H), F32),
        ))
    params["layers"] = layers
    params["proj_w"], params["proj_b"] = dense(keys[2 + num_layers], H, P)
    return params


# --------------------------------- main --------------------------------------

if __name__ == "__main__":
    # small synthetic config consistent with the module's forward:
    B = 2            # batch
    L = 8            # max_txt_len
    H = 32           # BERT hidden size
    NH = 4           # attention heads
    I = 64           # FFN intermediate size
    P = 16           # text_proj output dim
    NUM_LAYERS = 2   # text-mode encoder layers

    key = jax.random.PRNGKey(0)
    k_par, k_emb = jax.random.split(key)
    params = init_params(k_par, H=H, I=I, P=P, num_layers=NUM_LAYERS, max_txt_len=L)

    token_embds = jax.random.normal(k_emb, (B, L, H), F32)
    token_mask = jnp.array(
        [[1, 1, 1, 1, 1, 1, 1, 1],
         [1, 1, 1, 1, 1, 1, 0, 0]], dtype=jnp.int32)

    fwd = jax.jit(functools.partial(alpro_text_encoder, nh=NH, output_with_norm=True))
    text_feat = fwd(token_embds, token_mask, params)
    text_feat = jax.block_until_ready(text_feat)

    assert text_feat.shape == (B, P)
    assert bool(jnp.all(jnp.isfinite(text_feat)))
    norms = jnp.linalg.norm(text_feat, axis=-1)
    assert bool(jnp.all(jnp.abs(norms - 1.0) < 1e-4)), norms  # L2-normalized output

    print("KERNEL_OK")
</pallas_src>

<mosaic_0001>
module attributes {stable_mosaic.version = 11 : i64} {
  func.func @fused_layer_kernel(%arg0: i32, %arg1: memref<1x8x32xbf16, #tpu.memory_space<vmem>>, %arg2: memref<1x1x8xf32, #tpu.memory_space<vmem>>, %arg3: memref<8x32xf32, #tpu.memory_space<vmem>>, %arg4: memref<1x32xf32, #tpu.memory_space<vmem>>, %arg5: memref<1x32xf32, #tpu.memory_space<vmem>>, %arg6: memref<1x32xf32, #tpu.memory_space<vmem>>, %arg7: memref<32x96xbf16, #tpu.memory_space<vmem>>, %arg8: memref<1x96xf32, #tpu.memory_space<vmem>>, %arg9: memref<32x32xbf16, #tpu.memory_space<vmem>>, %arg10: memref<1x32xf32, #tpu.memory_space<vmem>>, %arg11: memref<1x32xf32, #tpu.memory_space<vmem>>, %arg12: memref<1x32xf32, #tpu.memory_space<vmem>>, %arg13: memref<32x64xbf16, #tpu.memory_space<vmem>>, %arg14: memref<1x64xf32, #tpu.memory_space<vmem>>, %arg15: memref<64x32xbf16, #tpu.memory_space<vmem>>, %arg16: memref<1x32xf32, #tpu.memory_space<vmem>>, %arg17: memref<1x32xf32, #tpu.memory_space<vmem>>, %arg18: memref<1x32xf32, #tpu.memory_space<vmem>>, %arg19: memref<1x8x32xbf16, #tpu.memory_space<vmem>>) attributes {dimension_semantics = [#tpu.dimension_semantics<parallel>], iteration_bounds = array<i64: 2>, scalar_prefetch = 0 : i64, scratch_operands = 0 : i64, tpu.core_type = #tpu.core_type<tc>, window_params = [{transform_indices = @transform_0, window_bounds = array<i64: 1, 8, 32>}, {transform_indices = @transform_1, window_bounds = array<i64: 1, 1, 8>}, {pipeline_mode = #tpu.pipeline_mode<synchronous>, transform_indices = @transform_2, window_bounds = array<i64: 8, 32>}, {pipeline_mode = #tpu.pipeline_mode<synchronous>, transform_indices = @transform_3, window_bounds = array<i64: 1, 32>}, {pipeline_mode = #tpu.pipeline_mode<synchronous>, transform_indices = @transform_4, window_bounds = array<i64: 1, 32>}, {pipeline_mode = #tpu.pipeline_mode<synchronous>, transform_indices = @transform_5, window_bounds = array<i64: 1, 32>}, {pipeline_mode = #tpu.pipeline_mode<synchronous>, transform_indices = @transform_6, window_bounds = array<i64: 32, 96>}, {pipeline_mode = #tpu.pipeline_mode<synchronous>, transform_indices = @transform_7, window_bounds = array<i64: 1, 96>}, {pipeline_mode = #tpu.pipeline_mode<synchronous>, transform_indices = @transform_8, window_bounds = array<i64: 32, 32>}, {pipeline_mode = #tpu.pipeline_mode<synchronous>, transform_indices = @transform_9, window_bounds = array<i64: 1, 32>}, {pipeline_mode = #tpu.pipeline_mode<synchronous>, transform_indices = @transform_10, window_bounds = array<i64: 1, 32>}, {pipeline_mode = #tpu.pipeline_mode<synchronous>, transform_indices = @transform_11, window_bounds = array<i64: 1, 32>}, {pipeline_mode = #tpu.pipeline_mode<synchronous>, transform_indices = @transform_12, window_bounds = array<i64: 32, 64>}, {pipeline_mode = #tpu.pipeline_mode<synchronous>, transform_indices = @transform_13, window_bounds = array<i64: 1, 64>}, {pipeline_mode = #tpu.pipeline_mode<synchronous>, transform_indices = @transform_14, window_bounds = array<i64: 64, 32>}, {pipeline_mode = #tpu.pipeline_mode<synchronous>, transform_indices = @transform_15, window_bounds = array<i64: 1, 32>}, {pipeline_mode = #tpu.pipeline_mode<synchronous>, transform_indices = @transform_16, window_bounds = array<i64: 1, 32>}, {pipeline_mode = #tpu.pipeline_mode<synchronous>, transform_indices = @transform_17, window_bounds = array<i64: 1, 32>}, {transform_indices = @transform_18, window_bounds = array<i64: 1, 8, 32>}]} {
    %c0 = arith.constant 0 : index
    %c0_0 = arith.constant 0 : index
    %c0_1 = arith.constant 0 : index
    %0 = vector.load %arg1[%c0, %c0_0, %c0_1] : memref<1x8x32xbf16, #tpu.memory_space<vmem>>, vector<1x8x32xbf16>
    %1 = arith.extf %0 : vector<1x8x32xbf16> to vector<1x8x32xf32>
    %c0_2 = arith.constant 0 : index
    %c0_3 = arith.constant 0 : index
    %2 = vector.load %arg3[%c0_2, %c0_3] : memref<8x32xf32, #tpu.memory_space<vmem>>, vector<8x32xf32>
    %3 = vector.shape_cast %2 : vector<8x32xf32> to vector<1x8x32xf32>
    %4 = arith.addf %1, %3 : vector<1x8x32xf32>
    %c0_4 = arith.constant 0 : index
    %c0_5 = arith.constant 0 : index
    %5 = vector.load %arg4[%c0_4, %c0_5] : memref<1x32xf32, #tpu.memory_space<vmem>>, vector<1x32xf32>
    %6 = vector.shape_cast %5 : vector<1x32xf32> to vector<1x1x32xf32>
    %7 = vector.broadcast %6 : vector<1x1x32xf32> to vector<1x8x32xf32>
    %8 = arith.addf %4, %7 : vector<1x8x32xf32>
    %c0_6 = arith.constant 0 : index
    %c0_7 = arith.constant 0 : index
    %9 = vector.load %arg5[%c0_6, %c0_7] : memref<1x32xf32, #tpu.memory_space<vmem>>, vector<1x32xf32>
    %c0_8 = arith.constant 0 : index
    %c0_9 = arith.constant 0 : index
    %10 = vector.load %arg6[%c0_8, %c0_9] : memref<1x32xf32, #tpu.memory_space<vmem>>, vector<1x32xf32>
    %cst = arith.constant dense<0.000000e+00> : vector<1x8xf32>
    %11 = vector.multi_reduction <add>, %8, %cst [2] : vector<1x8x32xf32> to vector<1x8xf32>
    %12 = vector.shape_cast %11 : vector<1x8xf32> to vector<1x8x1xf32>
    %cst_10 = arith.constant 3.200000e+01 : f32
    %13 = vector.broadcast %cst_10 : f32 to vector<1x8x1xf32>
    %14 = arith.divf %12, %13 : vector<1x8x1xf32>
    %15 = vector.broadcast %14 : vector<1x8x1xf32> to vector<1x8x32xf32>
    %16 = arith.subf %8, %15 : vector<1x8x32xf32>
    %17 = arith.mulf %16, %16 : vector<1x8x32xf32>
    %cst_11 = arith.constant dense<0.000000e+00> : vector<1x8xf32>
    %18 = vector.multi_reduction <add>, %17, %cst_11 [2] : vector<1x8x32xf32> to vector<1x8xf32>
    %19 = vector.shape_cast %18 : vector<1x8xf32> to vector<1x8x1xf32>
    %cst_12 = arith.constant 3.200000e+01 : f32
    %20 = vector.broadcast %cst_12 : f32 to vector<1x8x1xf32>
    %21 = arith.divf %19, %20 : vector<1x8x1xf32>
    %22 = vector.broadcast %14 : vector<1x8x1xf32> to vector<1x8x32xf32>
    %23 = arith.subf %8, %22 : vector<1x8x32xf32>
    %cst_13 = arith.constant 9.99999996E-13 : f32
    %24 = vector.broadcast %cst_13 : f32 to vector<1x8x1xf32>
    %25 = arith.addf %21, %24 : vector<1x8x1xf32>
    %26 = math.rsqrt %25 : vector<1x8x1xf32>
    %27 = vector.broadcast %26 : vector<1x8x1xf32> to vector<1x8x32xf32>
    %28 = arith.mulf %23, %27 : vector<1x8x32xf32>
    %29 = vector.shape_cast %9 : vector<1x32xf32> to vector<1x1x32xf32>
    %30 = vector.broadcast %29 : vector<1x1x32xf32> to vector<1x8x32xf32>
    %31 = arith.mulf %28, %30 : vector<1x8x32xf32>
    %32 = vector.shape_cast %10 : vector<1x32xf32> to vector<1x1x32xf32>
    %33 = vector.broadcast %32 : vector<1x1x32xf32> to vector<1x8x32xf32>
    %34 = arith.addf %31, %33 : vector<1x8x32xf32>
    %35 = arith.truncf %34 : vector<1x8x32xf32> to vector<1x8x32xbf16>
    %36 = vector.shape_cast %34 : vector<1x8x32xf32> to vector<8x32xf32>
    %37 = vector.shape_cast %35 : vector<1x8x32xbf16> to vector<8x32xbf16>
    %c0_14 = arith.constant 0 : index
    %c0_15 = arith.constant 0 : index
    %38 = vector.load %arg7[%c0_14, %c0_15] : memref<32x96xbf16, #tpu.memory_space<vmem>>, vector<32x96xbf16>
    %cst_16 = arith.constant dense<0.000000e+00> : vector<8x96xf32>
    %39 = tpu.matmul %37, %38, %cst_16 {dimension_numbers = #tpu.dot_dimension_numbers<[1], [0], [0], [1], [0, 0, 1, 1], [], []>} : vector<8x32xbf16>, vector<32x96xbf16>, vector<8x96xf32> -> vector<8x96xf32>
    %c0_17 = arith.constant 0 : index
    %c0_18 = arith.constant 0 : index
    %40 = vector.load %arg8[%c0_17, %c0_18] : memref<1x96xf32, #tpu.memory_space<vmem>>, vector<1x96xf32>
    %41 = vector.broadcast %40 : vector<1x96xf32> to vector<8x96xf32>
    %42 = arith.addf %39, %41 : vector<8x96xf32>
    %43 = vector.extract_strided_slice %42 {offsets = [0, 0], sizes = [8, 32], strides = [1, 1]} : vector<8x96xf32> to vector<8x32xf32>
    %cst_19 = arith.constant 0.353553385 : f32
    %44 = vector.broadcast %cst_19 : f32 to vector<8x32xf32>
    %45 = arith.mulf %43, %44 : vector<8x32xf32>
    %46 = arith.truncf %45 : vector<8x32xf32> to vector<8x32xbf16>
    %47 = vector.extract_strided_slice %42 {offsets = [0, 32], sizes = [8, 32], strides = [1, 1]} : vector<8x96xf32> to vector<8x32xf32>
    %48 = arith.truncf %47 : vector<8x32xf32> to vector<8x32xbf16>
    %49 = vector.extract_strided_slice %42 {offsets = [0, 64], sizes = [8, 32], strides = [1, 1]} : vector<8x96xf32> to vector<8x32xf32>
    %50 = arith.truncf %49 : vector<8x32xf32> to vector<8x32xbf16>
    %c0_20 = arith.constant 0 : index
    %c0_21 = arith.constant 0 : index
    %51 = vector.load %arg9[%c0_20, %c0_21] : memref<32x32xbf16, #tpu.memory_space<vmem>>, vector<32x32xbf16>
    %c0_22 = arith.constant 0 : index
    %c0_23 = arith.constant 0 : index
    %c0_24 = arith.constant 0 : index
    %52 = vector.load %arg2[%c0_22, %c0_23, %c0_24] : memref<1x1x8xf32, #tpu.memory_space<vmem>>, vector<1x1x8xf32>
    %53 = vector.shape_cast %52 : vector<1x1x8xf32> to vector<1x8xf32>
    %54 = vector.extract_strided_slice %46 {offsets = [0, 0], sizes = [8, 8], strides = [1, 1]} : vector<8x32xbf16> to vector<8x8xbf16>
    %55 = vector.extract_strided_slice %48 {offsets = [0, 0], sizes = [8, 8], strides = [1, 1]} : vector<8x32xbf16> to vector<8x8xbf16>
    %cst_25 = arith.constant dense<0.000000e+00> : vector<8x8xf32>
    %56 = tpu.matmul %54, %55, %cst_25 {dimension_numbers = #tpu.dot_dimension_numbers<[1], [1], [0], [0], [0, 0, 1, 0], [], []>} : vector<8x8xbf16>, vector<8x8xbf16>, vector<8x8xf32> -> vector<8x8xf32>
    %57 = vector.broadcast %53 : vector<1x8xf32> to vector<8x8xf32>
    %58 = arith.addf %56, %57 : vector<8x8xf32>
    %cst_26 = arith.constant dense<0xFF800000> : vector<8xf32>
    %59 = vector.multi_reduction <maximumf>, %58, %cst_26 [1] : vector<8x8xf32> to vector<8xf32>
    %60 = vector.shape_cast %59 : vector<8xf32> to vector<8x1xf32>
    %61 = vector.broadcast %60 : vector<8x1xf32> to vector<8x8xf32>
    %62 = arith.subf %58, %61 : vector<8x8xf32>
    %63 = math.exp %62 : vector<8x8xf32>
    %cst_27 = arith.constant dense<0.000000e+00> : vector<8xf32>
    %64 = vector.multi_reduction <add>, %63, %cst_27 [1] : vector<8x8xf32> to vector<8xf32>
    %65 = vector.shape_cast %64 : vector<8xf32> to vector<8x1xf32>
    %66 = tpu.reciprocal %65 {approx = true} : vector<8x1xf32> -> vector<8x1xf32>
    %67 = vector.broadcast %66 : vector<8x1xf32> to vector<8x8xf32>
    %68 = arith.mulf %63, %67 : vector<8x8xf32>
    %69 = arith.truncf %68 : vector<8x8xf32> to vector<8x8xbf16>
    %70 = vector.extract_strided_slice %50 {offsets = [0, 0], sizes = [8, 8], strides = [1, 1]} : vector<8x32xbf16> to vector<8x8xbf16>
    %cst_28 = arith.constant dense<0.000000e+00> : vector<8x8xf32>
    %71 = tpu.matmul %69, %70, %cst_28 {dimension_numbers = #tpu.dot_dimension_numbers<[1], [0], [0], [1], [0, 0, 1, 1], [], []>} : vector<8x8xbf16>, vector<8x8xbf16>, vector<8x8xf32> -> vector<8x8xf32>
    %72 = arith.truncf %71 : vector<8x8xf32> to vector<8x8xbf16>
    %73 = vector.extract_strided_slice %51 {offsets = [0, 0], sizes = [8, 32], strides = [1, 1]} : vector<32x32xbf16> to vector<8x32xbf16>
    %cst_29 = arith.constant dense<0.000000e+00> : vector<8x32xf32>
    %74 = tpu.matmul %72, %73, %cst_29 {dimension_numbers = #tpu.dot_dimension_numbers<[1], [0], [0], [1], [0, 0, 1, 1], [], []>} : vector<8x8xbf16>, vector<8x32xbf16>, vector<8x32xf32> -> vector<8x32xf32>
    %75 = vector.extract_strided_slice %46 {offsets = [0, 8], sizes = [8, 8], strides = [1, 1]} : vector<8x32xbf16> to vector<8x8xbf16>
    %76 = vector.extract_strided_slice %48 {offsets = [0, 8], sizes = [8, 8], strides = [1, 1]} : vector<8x32xbf16> to vector<8x8xbf16>
    %cst_30 = arith.constant dense<0.000000e+00> : vector<8x8xf32>
    %77 = tpu.matmul %75, %76, %cst_30 {dimension_numbers = #tpu.dot_dimension_numbers<[1], [1], [0], [0], [0, 0, 1, 0], [], []>} : vector<8x8xbf16>, vector<8x8xbf16>, vector<8x8xf32> -> vector<8x8xf32>
    %78 = vector.broadcast %53 : vector<1x8xf32> to vector<8x8xf32>
    %79 = arith.addf %77, %78 : vector<8x8xf32>
    %cst_31 = arith.constant dense<0xFF800000> : vector<8xf32>
    %80 = vector.multi_reduction <maximumf>, %79, %cst_31 [1] : vector<8x8xf32> to vector<8xf32>
    %81 = vector.shape_cast %80 : vector<8xf32> to vector<8x1xf32>
    %82 = vector.broadcast %81 : vector<8x1xf32> to vector<8x8xf32>
    %83 = arith.subf %79, %82 : vector<8x8xf32>
    %84 = math.exp %83 : vector<8x8xf32>
    %cst_32 = arith.constant dense<0.000000e+00> : vector<8xf32>
    %85 = vector.multi_reduction <add>, %84, %cst_32 [1] : vector<8x8xf32> to vector<8xf32>
    %86 = vector.shape_cast %85 : vector<8xf32> to vector<8x1xf32>
    %87 = tpu.reciprocal %86 {approx = true} : vector<8x1xf32> -> vector<8x1xf32>
    %88 = vector.broadcast %87 : vector<8x1xf32> to vector<8x8xf32>
    %89 = arith.mulf %84, %88 : vector<8x8xf32>
    %90 = arith.truncf %89 : vector<8x8xf32> to vector<8x8xbf16>
    %91 = vector.extract_strided_slice %50 {offsets = [0, 8], sizes = [8, 8], strides = [1, 1]} : vector<8x32xbf16> to vector<8x8xbf16>
    %cst_33 = arith.constant dense<0.000000e+00> : vector<8x8xf32>
    %92 = tpu.matmul %90, %91, %cst_33 {dimension_numbers = #tpu.dot_dimension_numbers<[1], [0], [0], [1], [0, 0, 1, 1], [], []>} : vector<8x8xbf16>, vector<8x8xbf16>, vector<8x8xf32> -> vector<8x8xf32>
    %93 = arith.truncf %92 : vector<8x8xf32> to vector<8x8xbf16>
    %94 = vector.extract_strided_slice %51 {offsets = [8, 0], sizes = [8, 32], strides = [1, 1]} : vector<32x32xbf16> to vector<8x32xbf16>
    %cst_34 = arith.constant dense<0.000000e+00> : vector<8x32xf32>
    %95 = tpu.matmul %93, %94, %cst_34 {dimension_numbers = #tpu.dot_dimension_numbers<[1], [0], [0], [1], [0, 0, 1, 1], [], []>} : vector<8x8xbf16>, vector<8x32xbf16>, vector<8x32xf32> -> vector<8x32xf32>
    %96 = arith.addf %74, %95 : vector<8x32xf32>
    %97 = vector.extract_strided_slice %46 {offsets = [0, 16], sizes = [8, 8], strides = [1, 1]} : vector<8x32xbf16> to vector<8x8xbf16>
    %98 = vector.extract_strided_slice %48 {offsets = [0, 16], sizes = [8, 8], strides = [1, 1]} : vector<8x32xbf16> to vector<8x8xbf16>
    %cst_35 = arith.constant dense<0.000000e+00> : vector<8x8xf32>
    %99 = tpu.matmul %97, %98, %cst_35 {dimension_numbers = #tpu.dot_dimension_numbers<[1], [1], [0], [0], [0, 0, 1, 0], [], []>} : vector<8x8xbf16>, vector<8x8xbf16>, vector<8x8xf32> -> vector<8x8xf32>
    %100 = vector.broadcast %53 : vector<1x8xf32> to vector<8x8xf32>
    %101 = arith.addf %99, %100 : vector<8x8xf32>
    %cst_36 = arith.constant dense<0xFF800000> : vector<8xf32>
    %102 = vector.multi_reduction <maximumf>, %101, %cst_36 [1] : vector<8x8xf32> to vector<8xf32>
    %103 = vector.shape_cast %102 : vector<8xf32> to vector<8x1xf32>
    %104 = vector.broadcast %103 : vector<8x1xf32> to vector<8x8xf32>
    %105 = arith.subf %101, %104 : vector<8x8xf32>
    %106 = math.exp %105 : vector<8x8xf32>
    %cst_37 = arith.constant dense<0.000000e+00> : vector<8xf32>
    %107 = vector.multi_reduction <add>, %106, %cst_37 [1] : vector<8x8xf32> to vector<8xf32>
    %108 = vector.shape_cast %107 : vector<8xf32> to vector<8x1xf32>
    %109 = tpu.reciprocal %108 {approx = true} : vector<8x1xf32> -> vector<8x1xf32>
    %110 = vector.broadcast %109 : vector<8x1xf32> to vector<8x8xf32>
    %111 = arith.mulf %106, %110 : vector<8x8xf32>
    %112 = arith.truncf %111 : vector<8x8xf32> to vector<8x8xbf16>
    %113 = vector.extract_strided_slice %50 {offsets = [0, 16], sizes = [8, 8], strides = [1, 1]} : vector<8x32xbf16> to vector<8x8xbf16>
    %cst_38 = arith.constant dense<0.000000e+00> : vector<8x8xf32>
    %114 = tpu.matmul %112, %113, %cst_38 {dimension_numbers = #tpu.dot_dimension_numbers<[1], [0], [0], [1], [0, 0, 1, 1], [], []>} : vector<8x8xbf16>, vector<8x8xbf16>, vector<8x8xf32> -> vector<8x8xf32>
    %115 = arith.truncf %114 : vector<8x8xf32> to vector<8x8xbf16>
    %116 = vector.extract_strided_slice %51 {offsets = [16, 0], sizes = [8, 32], strides = [1, 1]} : vector<32x32xbf16> to vector<8x32xbf16>
    %cst_39 = arith.constant dense<0.000000e+00> : vector<8x32xf32>
    %117 = tpu.matmul %115, %116, %cst_39 {dimension_numbers = #tpu.dot_dimension_numbers<[1], [0], [0], [1], [0, 0, 1, 1], [], []>} : vector<8x8xbf16>, vector<8x32xbf16>, vector<8x32xf32> -> vector<8x32xf32>
    %118 = arith.addf %96, %117 : vector<8x32xf32>
    %119 = vector.extract_strided_slice %46 {offsets = [0, 24], sizes = [8, 8], strides = [1, 1]} : vector<8x32xbf16> to vector<8x8xbf16>
    %120 = vector.extract_strided_slice %48 {offsets = [0, 24], sizes = [8, 8], strides = [1, 1]} : vector<8x32xbf16> to vector<8x8xbf16>
    %cst_40 = arith.constant dense<0.000000e+00> : vector<8x8xf32>
    %121 = tpu.matmul %119, %120, %cst_40 {dimension_numbers = #tpu.dot_dimension_numbers<[1], [1], [0], [0], [0, 0, 1, 0], [], []>} : vector<8x8xbf16>, vector<8x8xbf16>, vector<8x8xf32> -> vector<8x8xf32>
    %122 = vector.broadcast %53 : vector<1x8xf32> to vector<8x8xf32>
    %123 = arith.addf %121, %122 : vector<8x8xf32>
    %cst_41 = arith.constant dense<0xFF800000> : vector<8xf32>
    %124 = vector.multi_reduction <maximumf>, %123, %cst_41 [1] : vector<8x8xf32> to vector<8xf32>
    %125 = vector.shape_cast %124 : vector<8xf32> to vector<8x1xf32>
    %126 = vector.broadcast %125 : vector<8x1xf32> to vector<8x8xf32>
    %127 = arith.subf %123, %126 : vector<8x8xf32>
    %128 = math.exp %127 : vector<8x8xf32>
    %cst_42 = arith.constant dense<0.000000e+00> : vector<8xf32>
    %129 = vector.multi_reduction <add>, %128, %cst_42 [1] : vector<8x8xf32> to vector<8xf32>
    %130 = vector.shape_cast %129 : vector<8xf32> to vector<8x1xf32>
    %131 = tpu.reciprocal %130 {approx = true} : vector<8x1xf32> -> vector<8x1xf32>
    %132 = vector.broadcast %131 : vector<8x1xf32> to vector<8x8xf32>
    %133 = arith.mulf %128, %132 : vector<8x8xf32>
    %134 = arith.truncf %133 : vector<8x8xf32> to vector<8x8xbf16>
    %135 = vector.extract_strided_slice %50 {offsets = [0, 24], sizes = [8, 8], strides = [1, 1]} : vector<8x32xbf16> to vector<8x8xbf16>
    %cst_43 = arith.constant dense<0.000000e+00> : vector<8x8xf32>
    %136 = tpu.matmul %134, %135, %cst_43 {dimension_numbers = #tpu.dot_dimension_numbers<[1], [0], [0], [1], [0, 0, 1, 1], [], []>} : vector<8x8xbf16>, vector<8x8xbf16>, vector<8x8xf32> -> vector<8x8xf32>
    %137 = arith.truncf %136 : vector<8x8xf32> to vector<8x8xbf16>
    %138 = vector.extract_strided_slice %51 {offsets = [24, 0], sizes = [8, 32], strides = [1, 1]} : vector<32x32xbf16> to vector<8x32xbf16>
    %cst_44 = arith.constant dense<0.000000e+00> : vector<8x32xf32>
    %139 = tpu.matmul %137, %138, %cst_44 {dimension_numbers = #tpu.dot_dimension_numbers<[1], [0], [0], [1], [0, 0, 1, 1], [], []>} : vector<8x8xbf16>, vector<8x32xbf16>, vector<8x32xf32> -> vector<8x32xf32>
    %140 = arith.addf %118, %139 : vector<8x32xf32>
    %c0_45 = arith.constant 0 : index
    %c0_46 = arith.constant 0 : index
    %141 = vector.load %arg10[%c0_45, %c0_46] : memref<1x32xf32, #tpu.memory_space<vmem>>, vector<1x32xf32>
    %142 = vector.broadcast %141 : vector<1x32xf32> to vector<8x32xf32>
    %143 = arith.addf %140, %142 : vector<8x32xf32>
    %144 = arith.addf %143, %36 : vector<8x32xf32>
    %c0_47 = arith.constant 0 : index
    %c0_48 = arith.constant 0 : index
    %145 = vector.load %arg11[%c0_47, %c0_48] : memref<1x32xf32, #tpu.memory_space<vmem>>, vector<1x32xf32>
    %c0_49 = arith.constant 0 : index
    %c0_50 = arith.constant 0 : index
    %146 = vector.load %arg12[%c0_49, %c0_50] : memref<1x32xf32, #tpu.memory_space<vmem>>, vector<1x32xf32>
    %cst_51 = arith.constant dense<0.000000e+00> : vector<8xf32>
    %147 = vector.multi_reduction <add>, %144, %cst_51 [1] : vector<8x32xf32> to vector<8xf32>
    %148 = vector.shape_cast %147 : vector<8xf32> to vector<8x1xf32>
    %cst_52 = arith.constant 3.200000e+01 : f32
    %149 = vector.broadcast %cst_52 : f32 to vector<8x1xf32>
    %150 = arith.divf %148, %149 : vector<8x1xf32>
    %151 = vector.broadcast %150 : vector<8x1xf32> to vector<8x32xf32>
    %152 = arith.subf %144, %151 : vector<8x32xf32>
    %153 = arith.mulf %152, %152 : vector<8x32xf32>
    %cst_53 = arith.constant dense<0.000000e+00> : vector<8xf32>
    %154 = vector.multi_reduction <add>, %153, %cst_53 [1] : vector<8x32xf32> to vector<8xf32>
    %155 = vector.shape_cast %154 : vector<8xf32> to vector<8x1xf32>
    %cst_54 = arith.constant 3.200000e+01 : f32
    %156 = vector.broadcast %cst_54 : f32 to vector<8x1xf32>
    %157 = arith.divf %155, %156 : vector<8x1xf32>
    %158 = vector.broadcast %150 : vector<8x1xf32> to vector<8x32xf32>
    %159 = arith.subf %144, %158 : vector<8x32xf32>
    %cst_55 = arith.constant 9.99999996E-13 : f32
    %160 = vector.broadcast %cst_55 : f32 to vector<8x1xf32>
    %161 = arith.addf %157, %160 : vector<8x1xf32>
    %162 = math.rsqrt %161 : vector<8x1xf32>
    %163 = vector.broadcast %162 : vector<8x1xf32> to vector<8x32xf32>
    %164 = arith.mulf %159, %163 : vector<8x32xf32>
    %165 = vector.broadcast %145 : vector<1x32xf32> to vector<8x32xf32>
    %166 = arith.mulf %164, %165 : vector<8x32xf32>
    %167 = vector.broadcast %146 : vector<1x32xf32> to vector<8x32xf32>
    %168 = arith.addf %166, %167 : vector<8x32xf32>
    %169 = arith.truncf %168 : vector<8x32xf32> to vector<8x32xbf16>
    %c0_56 = arith.constant 0 : index
    %c0_57 = arith.constant 0 : index
    %170 = vector.load %arg13[%c0_56, %c0_57] : memref<32x64xbf16, #tpu.memory_space<vmem>>, vector<32x64xbf16>
    %cst_58 = arith.constant dense<0.000000e+00> : vector<8x64xf32>
    %171 = tpu.matmul %169, %170, %cst_58 {dimension_numbers = #tpu.dot_dimension_numbers<[1], [0], [0], [1], [0, 0, 1, 1], [], []>} : vector<8x32xbf16>, vector<32x64xbf16>, vector<8x64xf32> -> vector<8x64xf32>
    %c0_59 = arith.constant 0 : index
    %c0_60 = arith.constant 0 : index
    %172 = vector.load %arg14[%c0_59, %c0_60] : memref<1x64xf32, #tpu.memory_space<vmem>>, vector<1x64xf32>
    %173 = vector.broadcast %172 : vector<1x64xf32> to vector<8x64xf32>
    %174 = arith.addf %171, %173 : vector<8x64xf32>
    %cst_61 = arith.constant 5.000000e-01 : f32
    %175 = vector.broadcast %cst_61 : f32 to vector<8x64xf32>
    %176 = arith.mulf %175, %174 : vector<8x64xf32>
    %cst_62 = arith.constant 0.707106769 : f32
    %177 = vector.broadcast %cst_62 : f32 to vector<8x64xf32>
    %178 = arith.mulf %174, %177 : vector<8x64xf32>
    %179 = math.absf %178 : vector<8x64xf32>
    %cst_63 = arith.constant 0.327591091 : f32
    %180 = vector.broadcast %cst_63 : f32 to vector<8x64xf32>
    %181 = arith.mulf %180, %179 : vector<8x64xf32>
    %cst_64 = arith.constant 1.000000e+00 : f32
    %182 = vector.broadcast %cst_64 : f32 to vector<8x64xf32>
    %183 = arith.addf %182, %181 : vector<8x64xf32>
    %cst_65 = arith.constant 1.000000e+00 : f32
    %184 = vector.broadcast %cst_65 : f32 to vector<8x64xf32>
    %185 = arith.divf %184, %183 : vector<8x64xf32>
    %cst_66 = arith.constant 1.06140542 : f32
    %186 = vector.broadcast %cst_66 : f32 to vector<8x64xf32>
    %187 = arith.mulf %186, %185 : vector<8x64xf32>
    %cst_67 = arith.constant -1.45315206 : f32
    %188 = vector.broadcast %cst_67 : f32 to vector<8x64xf32>
    %189 = arith.addf %187, %188 : vector<8x64xf32>
    %190 = arith.mulf %189, %185 : vector<8x64xf32>
    %cst_68 = arith.constant 1.42141378 : f32
    %191 = vector.broadcast %cst_68 : f32 to vector<8x64xf32>
    %192 = arith.addf %190, %191 : vector<8x64xf32>
    %193 = arith.mulf %192, %185 : vector<8x64xf32>
    %cst_69 = arith.constant -0.284496725 : f32
    %194 = vector.broadcast %cst_69 : f32 to vector<8x64xf32>
    %195 = arith.addf %193, %194 : vector<8x64xf32>
    %196 = arith.mulf %195, %185 : vector<8x64xf32>
    %cst_70 = arith.constant 0.254829586 : f32
    %197 = vector.broadcast %cst_70 : f32 to vector<8x64xf32>
    %198 = arith.addf %196, %197 : vector<8x64xf32>
    %199 = arith.mulf %198, %185 : vector<8x64xf32>
    %cst_71 = arith.constant 0.000000e+00 : f32
    %200 = vector.broadcast %cst_71 : f32 to vector<8x64xf32>
    %201 = arith.subf %200, %179 : vector<8x64xf32>
    %202 = arith.mulf %201, %179 : vector<8x64xf32>
    %203 = math.exp %202 : vector<8x64xf32>
    %204 = arith.mulf %199, %203 : vector<8x64xf32>
    %cst_72 = arith.constant 1.000000e+00 : f32
    %205 = vector.broadcast %cst_72 : f32 to vector<8x64xf32>
    %206 = arith.subf %205, %204 : vector<8x64xf32>
    %cst_73 = arith.constant 0.000000e+00 : f32
    %207 = vector.broadcast %cst_73 : f32 to vector<8x64xf32>
    %208 = arith.cmpf oge, %178, %207 : vector<8x64xf32>
    %cst_74 = arith.constant 0.000000e+00 : f32
    %209 = vector.broadcast %cst_74 : f32 to vector<8x64xf32>
    %210 = arith.subf %209, %206 : vector<8x64xf32>
    %211 = arith.select %208, %206, %210 : vector<8x64xi1>, vector<8x64xf32>
    %cst_75 = arith.constant 1.000000e+00 : f32
    %212 = vector.broadcast %cst_75 : f32 to vector<8x64xf32>
    %213 = arith.addf %212, %211 : vector<8x64xf32>
    %214 = arith.mulf %176, %213 : vector<8x64xf32>
    %215 = arith.truncf %214 : vector<8x64xf32> to vector<8x64xbf16>
    %c0_76 = arith.constant 0 : index
    %c0_77 = arith.constant 0 : index
    %216 = vector.load %arg15[%c0_76, %c0_77] : memref<64x32xbf16, #tpu.memory_space<vmem>>, vector<64x32xbf16>
    %cst_78 = arith.constant dense<0.000000e+00> : vector<8x32xf32>
    %217 = tpu.matmul %215, %216, %cst_78 {dimension_numbers = #tpu.dot_dimension_numbers<[1], [0], [0], [1], [0, 0, 1, 1], [], []>} : vector<8x64xbf16>, vector<64x32xbf16>, vector<8x32xf32> -> vector<8x32xf32>
    %c0_79 = arith.constant 0 : index
    %c0_80 = arith.constant 0 : index
    %218 = vector.load %arg16[%c0_79, %c0_80] : memref<1x32xf32, #tpu.memory_space<vmem>>, vector<1x32xf32>
    %219 = vector.broadcast %218 : vector<1x32xf32> to vector<8x32xf32>
    %220 = arith.addf %217, %219 : vector<8x32xf32>
    %221 = arith.addf %220, %168 : vector<8x32xf32>
    %c0_81 = arith.constant 0 : index
    %c0_82 = arith.constant 0 : index
    %222 = vector.load %arg17[%c0_81, %c0_82] : memref<1x32xf32, #tpu.memory_space<vmem>>, vector<1x32xf32>
    %c0_83 = arith.constant 0 : index
    %c0_84 = arith.constant 0 : index
    %223 = vector.load %arg18[%c0_83, %c0_84] : memref<1x32xf32, #tpu.memory_space<vmem>>, vector<1x32xf32>
    %cst_85 = arith.constant dense<0.000000e+00> : vector<8xf32>
    %224 = vector.multi_reduction <add>, %221, %cst_85 [1] : vector<8x32xf32> to vector<8xf32>
    %225 = vector.shape_cast %224 : vector<8xf32> to vector<8x1xf32>
    %cst_86 = arith.constant 3.200000e+01 : f32
    %226 = vector.broadcast %cst_86 : f32 to vector<8x1xf32>
    %227 = arith.divf %225, %226 : vector<8x1xf32>
    %228 = vector.broadcast %227 : vector<8x1xf32> to vector<8x32xf32>
    %229 = arith.subf %221, %228 : vector<8x32xf32>
    %230 = arith.mulf %229, %229 : vector<8x32xf32>
    %cst_87 = arith.constant dense<0.000000e+00> : vector<8xf32>
    %231 = vector.multi_reduction <add>, %230, %cst_87 [1] : vector<8x32xf32> to vector<8xf32>
    %232 = vector.shape_cast %231 : vector<8xf32> to vector<8x1xf32>
    %cst_88 = arith.constant 3.200000e+01 : f32
    %233 = vector.broadcast %cst_88 : f32 to vector<8x1xf32>
    %234 = arith.divf %232, %233 : vector<8x1xf32>
    %235 = vector.broadcast %227 : vector<8x1xf32> to vector<8x32xf32>
    %236 = arith.subf %221, %235 : vector<8x32xf32>
    %cst_89 = arith.constant 9.99999996E-13 : f32
    %237 = vector.broadcast %cst_89 : f32 to vector<8x1xf32>
    %238 = arith.addf %234, %237 : vector<8x1xf32>
    %239 = math.rsqrt %238 : vector<8x1xf32>
    %240 = vector.broadcast %239 : vector<8x1xf32> to vector<8x32xf32>
    %241 = arith.mulf %236, %240 : vector<8x32xf32>
    %242 = vector.broadcast %222 : vector<1x32xf32> to vector<8x32xf32>
    %243 = arith.mulf %241, %242 : vector<8x32xf32>
    %244 = vector.broadcast %223 : vector<1x32xf32> to vector<8x32xf32>
    %245 = arith.addf %243, %244 : vector<8x32xf32>
    %246 = vector.shape_cast %245 : vector<8x32xf32> to vector<1x8x32xf32>
    %247 = arith.truncf %246 : vector<1x8x32xf32> to vector<1x8x32xbf16>
    %c0_90 = arith.constant 0 : index
    %c0_91 = arith.constant 0 : index
    %c0_92 = arith.constant 0 : index
    %248 = vector.load %arg19[%c0_90, %c0_91, %c0_92] : memref<1x8x32xbf16, #tpu.memory_space<vmem>>, vector<1x8x32xbf16>
    tpu.vector_store %arg19[%c0_90, %c0_91, %c0_92], %247 {strides = array<i32>} : memref<1x8x32xbf16, #tpu.memory_space<vmem>>, vector<1x8x32xbf16>,
    return
  }
  func.func @transform_0(%arg0: i32) -> (i32, i32, i32) {
    %c0_i32 = arith.constant 0 : i32
    %c0_i32_0 = arith.constant 0 : i32
    %c0_i32_1 = arith.constant 0 : i32
    return %arg0, %c0_i32, %c0_i32_0 : i32, i32, i32
  }
  func.func @transform_1(%arg0: i32) -> (i32, i32, i32) {
    %c0_i32 = arith.constant 0 : i32
    %c0_i32_0 = arith.constant 0 : i32
    %c0_i32_1 = arith.constant 0 : i32
    return %arg0, %c0_i32, %c0_i32_0 : i32, i32, i32
  }
  func.func @transform_2(%arg0: i32) -> (i32, i32) {
    %c0_i32 = arith.constant 0 : i32
    %c0_i32_0 = arith.constant 0 : i32
    %c0_i32_1 = arith.constant 0 : i32
    return %c0_i32, %c0_i32_0 : i32, i32
  }
  func.func @transform_3(%arg0: i32) -> (i32, i32) {
    %c0_i32 = arith.constant 0 : i32
    %c0_i32_0 = arith.constant 0 : i32
    %c0_i32_1 = arith.constant 0 : i32
    return %c0_i32, %c0_i32_0 : i32, i32
  }
  func.func @transform_4(%arg0: i32) -> (i32, i32) {
    %c0_i32 = arith.constant 0 : i32
    %c0_i32_0 = arith.constant 0 : i32
    %c0_i32_1 = arith.constant 0 : i32
    return %c0_i32, %c0_i32_0 : i32, i32
  }
  func.func @transform_5(%arg0: i32) -> (i32, i32) {
    %c0_i32 = arith.constant 0 : i32
    %c0_i32_0 = arith.constant 0 : i32
    %c0_i32_1 = arith.constant 0 : i32
    return %c0_i32, %c0_i32_0 : i32, i32
  }
  func.func @transform_6(%arg0: i32) -> (i32, i32) {
    %c0_i32 = arith.constant 0 : i32
    %c0_i32_0 = arith.constant 0 : i32
    %c0_i32_1 = arith.constant 0 : i32
    return %c0_i32, %c0_i32_0 : i32, i32
  }
  func.func @transform_7(%arg0: i32) -> (i32, i32) {
    %c0_i32 = arith.constant 0 : i32
    %c0_i32_0 = arith.constant 0 : i32
    %c0_i32_1 = arith.constant 0 : i32
    return %c0_i32, %c0_i32_0 : i32, i32
  }
  func.func @transform_8(%arg0: i32) -> (i32, i32) {
    %c0_i32 = arith.constant 0 : i32
    %c0_i32_0 = arith.constant 0 : i32
    %c0_i32_1 = arith.constant 0 : i32
    return %c0_i32, %c0_i32_0 : i32, i32
  }
  func.func @transform_9(%arg0: i32) -> (i32, i32) {
    %c0_i32 = arith.constant 0 : i32
    %c0_i32_0 = arith.constant 0 : i32
    %c0_i32_1 = arith.constant 0 : i32
    return %c0_i32, %c0_i32_0 : i32, i32
  }
  func.func @transform_10(%arg0: i32) -> (i32, i32) {
    %c0_i32 = arith.constant 0 : i32
    %c0_i32_0 = arith.constant 0 : i32
    %c0_i32_1 = arith.constant 0 : i32
    return %c0_i32, %c0_i32_0 : i32, i32
  }
  func.func @transform_11(%arg0: i32) -> (i32, i32) {
    %c0_i32 = arith.constant 0 : i32
    %c0_i32_0 = arith.constant 0 : i32
    %c0_i32_1 = arith.constant 0 : i32
    return %c0_i32, %c0_i32_0 : i32, i32
  }
  func.func @transform_12(%arg0: i32) -> (i32, i32) {
    %c0_i32 = arith.constant 0 : i32
    %c0_i32_0 = arith.constant 0 : i32
    %c0_i32_1 = arith.constant 0 : i32
    return %c0_i32, %c0_i32_0 : i32, i32
  }
  func.func @transform_13(%arg0: i32) -> (i32, i32) {
    %c0_i32 = arith.constant 0 : i32
    %c0_i32_0 = arith.constant 0 : i32
    %c0_i32_1 = arith.constant 0 : i32
    return %c0_i32, %c0_i32_0 : i32, i32
  }
  func.func @transform_14(%arg0: i32) -> (i32, i32) {
    %c0_i32 = arith.constant 0 : i32
    %c0_i32_0 = arith.constant 0 : i32
    %c0_i32_1 = arith.constant 0 : i32
    return %c0_i32, %c0_i32_0 : i32, i32
  }
  func.func @transform_15(%arg0: i32) -> (i32, i32) {
    %c0_i32 = arith.constant 0 : i32
    %c0_i32_0 = arith.constant 0 : i32
    %c0_i32_1 = arith.constant 0 : i32
    return %c0_i32, %c0_i32_0 : i32, i32
  }
  func.func @transform_16(%arg0: i32) -> (i32, i32) {
    %c0_i32 = arith.constant 0 : i32
    %c0_i32_0 = arith.constant 0 : i32
    %c0_i32_1 = arith.constant 0 : i32
    return %c0_i32, %c0_i32_0 : i32, i32
  }
  func.func @transform_17(%arg0: i32) -> (i32, i32) {
    %c0_i32 = arith.constant 0 : i32
    %c0_i32_0 = arith.constant 0 : i32
    %c0_i32_1 = arith.constant 0 : i32
    return %c0_i32, %c0_i32_0 : i32, i32
  }
  func.func @transform_18(%arg0: i32) -> (i32, i32, i32) {
    %c0_i32 = arith.constant 0 : i32
    %c0_i32_0 = arith.constant 0 : i32
    %c0_i32_1 = arith.constant 0 : i32
    return %arg0, %c0_i32, %c0_i32_0 : i32, i32, i32
  }
}

module attributes {stable_mosaic.version = 11 : i64} {
  func.func @fused_layer_kernel(%arg0: i32, %arg1: memref<1x8x32xbf16, #tpu.memory_space<vmem>>, %arg2: memref<1x1x8xf32, #tpu.memory_space<vmem>>, %arg3: memref<32x96xbf16, #tpu.memory_space<vmem>>, %arg4: memref<1x96xf32, #tpu.memory_space<vmem>>, %arg5: memref<32x32xbf16, #tpu.memory_space<vmem>>, %arg6: memref<1x32xf32, #tpu.memory_space<vmem>>, %arg7: memref<1x32xf32, #tpu.memory_space<vmem>>, %arg8: memref<1x32xf32, #tpu.memory_space<vmem>>, %arg9: memref<32x64xbf16, #tpu.memory_space<vmem>>, %arg10: memref<1x64xf32, #tpu.memory_space<vmem>>, %arg11: memref<64x32xbf16, #tpu.memory_space<vmem>>, %arg12: memref<1x32xf32, #tpu.memory_space<vmem>>, %arg13: memref<1x32xf32, #tpu.memory_space<vmem>>, %arg14: memref<1x32xf32, #tpu.memory_space<vmem>>, %arg15: memref<32x16xbf16, #tpu.memory_space<vmem>>, %arg16: memref<1x16xf32, #tpu.memory_space<vmem>>, %arg17: memref<1x1x16xf32, #tpu.memory_space<vmem>>) attributes {dimension_semantics = [#tpu.dimension_semantics<parallel>], iteration_bounds = array<i64: 2>, scalar_prefetch = 0 : i64, scratch_operands = 0 : i64, tpu.core_type = #tpu.core_type<tc>, window_params = [{transform_indices = @transform_0, window_bounds = array<i64: 1, 8, 32>}, {transform_indices = @transform_1, window_bounds = array<i64: 1, 1, 8>}, {pipeline_mode = #tpu.pipeline_mode<synchronous>, transform_indices = @transform_2, window_bounds = array<i64: 32, 96>}, {pipeline_mode = #tpu.pipeline_mode<synchronous>, transform_indices = @transform_3, window_bounds = array<i64: 1, 96>}, {pipeline_mode = #tpu.pipeline_mode<synchronous>, transform_indices = @transform_4, window_bounds = array<i64: 32, 32>}, {pipeline_mode = #tpu.pipeline_mode<synchronous>, transform_indices = @transform_5, window_bounds = array<i64: 1, 32>}, {pipeline_mode = #tpu.pipeline_mode<synchronous>, transform_indices = @transform_6, window_bounds = array<i64: 1, 32>}, {pipeline_mode = #tpu.pipeline_mode<synchronous>, transform_indices = @transform_7, window_bounds = array<i64: 1, 32>}, {pipeline_mode = #tpu.pipeline_mode<synchronous>, transform_indices = @transform_8, window_bounds = array<i64: 32, 64>}, {pipeline_mode = #tpu.pipeline_mode<synchronous>, transform_indices = @transform_9, window_bounds = array<i64: 1, 64>}, {pipeline_mode = #tpu.pipeline_mode<synchronous>, transform_indices = @transform_10, window_bounds = array<i64: 64, 32>}, {pipeline_mode = #tpu.pipeline_mode<synchronous>, transform_indices = @transform_11, window_bounds = array<i64: 1, 32>}, {pipeline_mode = #tpu.pipeline_mode<synchronous>, transform_indices = @transform_12, window_bounds = array<i64: 1, 32>}, {pipeline_mode = #tpu.pipeline_mode<synchronous>, transform_indices = @transform_13, window_bounds = array<i64: 1, 32>}, {pipeline_mode = #tpu.pipeline_mode<synchronous>, transform_indices = @transform_14, window_bounds = array<i64: 32, 16>}, {pipeline_mode = #tpu.pipeline_mode<synchronous>, transform_indices = @transform_15, window_bounds = array<i64: 1, 16>}, {transform_indices = @transform_16, window_bounds = array<i64: 1, 1, 16>}]} {
    %c0 = arith.constant 0 : index
    %c0_0 = arith.constant 0 : index
    %c0_1 = arith.constant 0 : index
    %0 = vector.load %arg1[%c0, %c0_0, %c0_1] : memref<1x8x32xbf16, #tpu.memory_space<vmem>>, vector<1x8x32xbf16>
    %1 = arith.extf %0 : vector<1x8x32xbf16> to vector<1x8x32xf32>
    %2 = vector.shape_cast %0 : vector<1x8x32xbf16> to vector<8x32xbf16>
    %c0_2 = arith.constant 0 : index
    %c0_3 = arith.constant 0 : index
    %3 = vector.load %arg3[%c0_2, %c0_3] : memref<32x96xbf16, #tpu.memory_space<vmem>>, vector<32x96xbf16>
    %cst = arith.constant dense<0.000000e+00> : vector<8x96xf32>
    %4 = tpu.matmul %2, %3, %cst {dimension_numbers = #tpu.dot_dimension_numbers<[1], [0], [0], [1], [0, 0, 1, 1], [], []>} : vector<8x32xbf16>, vector<32x96xbf16>, vector<8x96xf32> -> vector<8x96xf32>
    %c0_4 = arith.constant 0 : index
    %c0_5 = arith.constant 0 : index
    %5 = vector.load %arg4[%c0_4, %c0_5] : memref<1x96xf32, #tpu.memory_space<vmem>>, vector<1x96xf32>
    %6 = vector.broadcast %5 : vector<1x96xf32> to vector<8x96xf32>
    %7 = arith.addf %4, %6 : vector<8x96xf32>
    %8 = vector.extract_strided_slice %7 {offsets = [0, 0], sizes = [8, 32], strides = [1, 1]} : vector<8x96xf32> to vector<8x32xf32>
    %cst_6 = arith.constant 0.353553385 : f32
    %9 = vector.broadcast %cst_6 : f32 to vector<8x32xf32>
    %10 = arith.mulf %8, %9 : vector<8x32xf32>
    %11 = arith.truncf %10 : vector<8x32xf32> to vector<8x32xbf16>
    %12 = vector.extract_strided_slice %7 {offsets = [0, 32], sizes = [8, 32], strides = [1, 1]} : vector<8x96xf32> to vector<8x32xf32>
    %13 = arith.truncf %12 : vector<8x32xf32> to vector<8x32xbf16>
    %14 = vector.extract_strided_slice %7 {offsets = [0, 64], sizes = [8, 32], strides = [1, 1]} : vector<8x96xf32> to vector<8x32xf32>
    %15 = arith.truncf %14 : vector<8x32xf32> to vector<8x32xbf16>
    %c0_7 = arith.constant 0 : index
    %c0_8 = arith.constant 0 : index
    %16 = vector.load %arg5[%c0_7, %c0_8] : memref<32x32xbf16, #tpu.memory_space<vmem>>, vector<32x32xbf16>
    %c0_9 = arith.constant 0 : index
    %c0_10 = arith.constant 0 : index
    %c0_11 = arith.constant 0 : index
    %17 = vector.load %arg2[%c0_9, %c0_10, %c0_11] : memref<1x1x8xf32, #tpu.memory_space<vmem>>, vector<1x1x8xf32>
    %18 = vector.shape_cast %17 : vector<1x1x8xf32> to vector<1x8xf32>
    %19 = vector.extract_strided_slice %11 {offsets = [0, 0], sizes = [1, 32], strides = [1, 1]} : vector<8x32xbf16> to vector<1x32xbf16>
    %20 = vector.extract_strided_slice %19 {offsets = [0, 0], sizes = [1, 8], strides = [1, 1]} : vector<1x32xbf16> to vector<1x8xbf16>
    %21 = vector.extract_strided_slice %13 {offsets = [0, 0], sizes = [8, 8], strides = [1, 1]} : vector<8x32xbf16> to vector<8x8xbf16>
    %cst_12 = arith.constant dense<0.000000e+00> : vector<1x8xf32>
    %22 = tpu.matmul %20, %21, %cst_12 {dimension_numbers = #tpu.dot_dimension_numbers<[1], [1], [0], [0], [0, 0, 1, 0], [], []>} : vector<1x8xbf16>, vector<8x8xbf16>, vector<1x8xf32> -> vector<1x8xf32>
    %23 = arith.addf %22, %18 : vector<1x8xf32>
    %cst_13 = arith.constant dense<0xFF800000> : vector<1xf32>
    %24 = vector.multi_reduction <maximumf>, %23, %cst_13 [1] : vector<1x8xf32> to vector<1xf32>
    %25 = vector.shape_cast %24 : vector<1xf32> to vector<1x1xf32>
    %26 = vector.broadcast %25 : vector<1x1xf32> to vector<1x8xf32>
    %27 = arith.subf %23, %26 : vector<1x8xf32>
    %28 = math.exp %27 : vector<1x8xf32>
    %cst_14 = arith.constant dense<0.000000e+00> : vector<1xf32>
    %29 = vector.multi_reduction <add>, %28, %cst_14 [1] : vector<1x8xf32> to vector<1xf32>
    %30 = vector.shape_cast %29 : vector<1xf32> to vector<1x1xf32>
    %31 = tpu.reciprocal %30 {approx = true} : vector<1x1xf32> -> vector<1x1xf32>
    %32 = vector.broadcast %31 : vector<1x1xf32> to vector<1x8xf32>
    %33 = arith.mulf %28, %32 : vector<1x8xf32>
    %34 = arith.truncf %33 : vector<1x8xf32> to vector<1x8xbf16>
    %35 = vector.extract_strided_slice %15 {offsets = [0, 0], sizes = [8, 8], strides = [1, 1]} : vector<8x32xbf16> to vector<8x8xbf16>
    %cst_15 = arith.constant dense<0.000000e+00> : vector<1x8xf32>
    %36 = tpu.matmul %34, %35, %cst_15 {dimension_numbers = #tpu.dot_dimension_numbers<[1], [0], [0], [1], [0, 0, 1, 1], [], []>} : vector<1x8xbf16>, vector<8x8xbf16>, vector<1x8xf32> -> vector<1x8xf32>
    %37 = arith.truncf %36 : vector<1x8xf32> to vector<1x8xbf16>
    %38 = vector.extract_strided_slice %16 {offsets = [0, 0], sizes = [8, 32], strides = [1, 1]} : vector<32x32xbf16> to vector<8x32xbf16>
    %cst_16 = arith.constant dense<0.000000e+00> : vector<1x32xf32>
    %39 = tpu.matmul %37, %38, %cst_16 {dimension_numbers = #tpu.dot_dimension_numbers<[1], [0], [0], [1], [0, 0, 1, 1], [], []>} : vector<1x8xbf16>, vector<8x32xbf16>, vector<1x32xf32> -> vector<1x32xf32>
    %40 = vector.extract_strided_slice %19 {offsets = [0, 8], sizes = [1, 8], strides = [1, 1]} : vector<1x32xbf16> to vector<1x8xbf16>
    %41 = vector.extract_strided_slice %13 {offsets = [0, 8], sizes = [8, 8], strides = [1, 1]} : vector<8x32xbf16> to vector<8x8xbf16>
    %cst_17 = arith.constant dense<0.000000e+00> : vector<1x8xf32>
    %42 = tpu.matmul %40, %41, %cst_17 {dimension_numbers = #tpu.dot_dimension_numbers<[1], [1], [0], [0], [0, 0, 1, 0], [], []>} : vector<1x8xbf16>, vector<8x8xbf16>, vector<1x8xf32> -> vector<1x8xf32>
    %43 = arith.addf %42, %18 : vector<1x8xf32>
    %cst_18 = arith.constant dense<0xFF800000> : vector<1xf32>
    %44 = vector.multi_reduction <maximumf>, %43, %cst_18 [1] : vector<1x8xf32> to vector<1xf32>
    %45 = vector.shape_cast %44 : vector<1xf32> to vector<1x1xf32>
    %46 = vector.broadcast %45 : vector<1x1xf32> to vector<1x8xf32>
    %47 = arith.subf %43, %46 : vector<1x8xf32>
    %48 = math.exp %47 : vector<1x8xf32>
    %cst_19 = arith.constant dense<0.000000e+00> : vector<1xf32>
    %49 = vector.multi_reduction <add>, %48, %cst_19 [1] : vector<1x8xf32> to vector<1xf32>
    %50 = vector.shape_cast %49 : vector<1xf32> to vector<1x1xf32>
    %51 = tpu.reciprocal %50 {approx = true} : vector<1x1xf32> -> vector<1x1xf32>
    %52 = vector.broadcast %51 : vector<1x1xf32> to vector<1x8xf32>
    %53 = arith.mulf %48, %52 : vector<1x8xf32>
    %54 = arith.truncf %53 : vector<1x8xf32> to vector<1x8xbf16>
    %55 = vector.extract_strided_slice %15 {offsets = [0, 8], sizes = [8, 8], strides = [1, 1]} : vector<8x32xbf16> to vector<8x8xbf16>
    %cst_20 = arith.constant dense<0.000000e+00> : vector<1x8xf32>
    %56 = tpu.matmul %54, %55, %cst_20 {dimension_numbers = #tpu.dot_dimension_numbers<[1], [0], [0], [1], [0, 0, 1, 1], [], []>} : vector<1x8xbf16>, vector<8x8xbf16>, vector<1x8xf32> -> vector<1x8xf32>
    %57 = arith.truncf %56 : vector<1x8xf32> to vector<1x8xbf16>
    %58 = vector.extract_strided_slice %16 {offsets = [8, 0], sizes = [8, 32], strides = [1, 1]} : vector<32x32xbf16> to vector<8x32xbf16>
    %cst_21 = arith.constant dense<0.000000e+00> : vector<1x32xf32>
    %59 = tpu.matmul %57, %58, %cst_21 {dimension_numbers = #tpu.dot_dimension_numbers<[1], [0], [0], [1], [0, 0, 1, 1], [], []>} : vector<1x8xbf16>, vector<8x32xbf16>, vector<1x32xf32> -> vector<1x32xf32>
    %60 = arith.addf %39, %59 : vector<1x32xf32>
    %61 = vector.extract_strided_slice %19 {offsets = [0, 16], sizes = [1, 8], strides = [1, 1]} : vector<1x32xbf16> to vector<1x8xbf16>
    %62 = vector.extract_strided_slice %13 {offsets = [0, 16], sizes = [8, 8], strides = [1, 1]} : vector<8x32xbf16> to vector<8x8xbf16>
    %cst_22 = arith.constant dense<0.000000e+00> : vector<1x8xf32>
    %63 = tpu.matmul %61, %62, %cst_22 {dimension_numbers = #tpu.dot_dimension_numbers<[1], [1], [0], [0], [0, 0, 1, 0], [], []>} : vector<1x8xbf16>, vector<8x8xbf16>, vector<1x8xf32> -> vector<1x8xf32>
    %64 = arith.addf %63, %18 : vector<1x8xf32>
    %cst_23 = arith.constant dense<0xFF800000> : vector<1xf32>
    %65 = vector.multi_reduction <maximumf>, %64, %cst_23 [1] : vector<1x8xf32> to vector<1xf32>
    %66 = vector.shape_cast %65 : vector<1xf32> to vector<1x1xf32>
    %67 = vector.broadcast %66 : vector<1x1xf32> to vector<1x8xf32>
    %68 = arith.subf %64, %67 : vector<1x8xf32>
    %69 = math.exp %68 : vector<1x8xf32>
    %cst_24 = arith.constant dense<0.000000e+00> : vector<1xf32>
    %70 = vector.multi_reduction <add>, %69, %cst_24 [1] : vector<1x8xf32> to vector<1xf32>
    %71 = vector.shape_cast %70 : vector<1xf32> to vector<1x1xf32>
    %72 = tpu.reciprocal %71 {approx = true} : vector<1x1xf32> -> vector<1x1xf32>
    %73 = vector.broadcast %72 : vector<1x1xf32> to vector<1x8xf32>
    %74 = arith.mulf %69, %73 : vector<1x8xf32>
    %75 = arith.truncf %74 : vector<1x8xf32> to vector<1x8xbf16>
    %76 = vector.extract_strided_slice %15 {offsets = [0, 16], sizes = [8, 8], strides = [1, 1]} : vector<8x32xbf16> to vector<8x8xbf16>
    %cst_25 = arith.constant dense<0.000000e+00> : vector<1x8xf32>
    %77 = tpu.matmul %75, %76, %cst_25 {dimension_numbers = #tpu.dot_dimension_numbers<[1], [0], [0], [1], [0, 0, 1, 1], [], []>} : vector<1x8xbf16>, vector<8x8xbf16>, vector<1x8xf32> -> vector<1x8xf32>
    %78 = arith.truncf %77 : vector<1x8xf32> to vector<1x8xbf16>
    %79 = vector.extract_strided_slice %16 {offsets = [16, 0], sizes = [8, 32], strides = [1, 1]} : vector<32x32xbf16> to vector<8x32xbf16>
    %cst_26 = arith.constant dense<0.000000e+00> : vector<1x32xf32>
    %80 = tpu.matmul %78, %79, %cst_26 {dimension_numbers = #tpu.dot_dimension_numbers<[1], [0], [0], [1], [0, 0, 1, 1], [], []>} : vector<1x8xbf16>, vector<8x32xbf16>, vector<1x32xf32> -> vector<1x32xf32>
    %81 = arith.addf %60, %80 : vector<1x32xf32>
    %82 = vector.extract_strided_slice %19 {offsets = [0, 24], sizes = [1, 8], strides = [1, 1]} : vector<1x32xbf16> to vector<1x8xbf16>
    %83 = vector.extract_strided_slice %13 {offsets = [0, 24], sizes = [8, 8], strides = [1, 1]} : vector<8x32xbf16> to vector<8x8xbf16>
    %cst_27 = arith.constant dense<0.000000e+00> : vector<1x8xf32>
    %84 = tpu.matmul %82, %83, %cst_27 {dimension_numbers = #tpu.dot_dimension_numbers<[1], [1], [0], [0], [0, 0, 1, 0], [], []>} : vector<1x8xbf16>, vector<8x8xbf16>, vector<1x8xf32> -> vector<1x8xf32>
    %85 = arith.addf %84, %18 : vector<1x8xf32>
    %cst_28 = arith.constant dense<0xFF800000> : vector<1xf32>
    %86 = vector.multi_reduction <maximumf>, %85, %cst_28 [1] : vector<1x8xf32> to vector<1xf32>
    %87 = vector.shape_cast %86 : vector<1xf32> to vector<1x1xf32>
    %88 = vector.broadcast %87 : vector<1x1xf32> to vector<1x8xf32>
    %89 = arith.subf %85, %88 : vector<1x8xf32>
    %90 = math.exp %89 : vector<1x8xf32>
    %cst_29 = arith.constant dense<0.000000e+00> : vector<1xf32>
    %91 = vector.multi_reduction <add>, %90, %cst_29 [1] : vector<1x8xf32> to vector<1xf32>
    %92 = vector.shape_cast %91 : vector<1xf32> to vector<1x1xf32>
    %93 = tpu.reciprocal %92 {approx = true} : vector<1x1xf32> -> vector<1x1xf32>
    %94 = vector.broadcast %93 : vector<1x1xf32> to vector<1x8xf32>
    %95 = arith.mulf %90, %94 : vector<1x8xf32>
    %96 = arith.truncf %95 : vector<1x8xf32> to vector<1x8xbf16>
    %97 = vector.extract_strided_slice %15 {offsets = [0, 24], sizes = [8, 8], strides = [1, 1]} : vector<8x32xbf16> to vector<8x8xbf16>
    %cst_30 = arith.constant dense<0.000000e+00> : vector<1x8xf32>
    %98 = tpu.matmul %96, %97, %cst_30 {dimension_numbers = #tpu.dot_dimension_numbers<[1], [0], [0], [1], [0, 0, 1, 1], [], []>} : vector<1x8xbf16>, vector<8x8xbf16>, vector<1x8xf32> -> vector<1x8xf32>
    %99 = arith.truncf %98 : vector<1x8xf32> to vector<1x8xbf16>
    %100 = vector.extract_strided_slice %16 {offsets = [24, 0], sizes = [8, 32], strides = [1, 1]} : vector<32x32xbf16> to vector<8x32xbf16>
    %cst_31 = arith.constant dense<0.000000e+00> : vector<1x32xf32>
    %101 = tpu.matmul %99, %100, %cst_31 {dimension_numbers = #tpu.dot_dimension_numbers<[1], [0], [0], [1], [0, 0, 1, 1], [], []>} : vector<1x8xbf16>, vector<8x32xbf16>, vector<1x32xf32> -> vector<1x32xf32>
    %102 = arith.addf %81, %101 : vector<1x32xf32>
    %c0_32 = arith.constant 0 : index
    %c0_33 = arith.constant 0 : index
    %103 = vector.load %arg6[%c0_32, %c0_33] : memref<1x32xf32, #tpu.memory_space<vmem>>, vector<1x32xf32>
    %104 = arith.addf %102, %103 : vector<1x32xf32>
    %105 = vector.extract_strided_slice %1 {offsets = [0, 0, 0], sizes = [1, 1, 32], strides = [1, 1, 1]} : vector<1x8x32xf32> to vector<1x1x32xf32>
    %106 = vector.shape_cast %105 : vector<1x1x32xf32> to vector<1x32xf32>
    %107 = arith.addf %104, %106 : vector<1x32xf32>
    %c0_34 = arith.constant 0 : index
    %c0_35 = arith.constant 0 : index
    %108 = vector.load %arg7[%c0_34, %c0_35] : memref<1x32xf32, #tpu.memory_space<vmem>>, vector<1x32xf32>
    %c0_36 = arith.constant 0 : index
    %c0_37 = arith.constant 0 : index
    %109 = vector.load %arg8[%c0_36, %c0_37] : memref<1x32xf32, #tpu.memory_space<vmem>>, vector<1x32xf32>
    %cst_38 = arith.constant dense<0.000000e+00> : vector<1xf32>
    %110 = vector.multi_reduction <add>, %107, %cst_38 [1] : vector<1x32xf32> to vector<1xf32>
    %111 = vector.shape_cast %110 : vector<1xf32> to vector<1x1xf32>
    %cst_39 = arith.constant 3.200000e+01 : f32
    %112 = vector.broadcast %cst_39 : f32 to vector<1x1xf32>
    %113 = arith.divf %111, %112 : vector<1x1xf32>
    %114 = vector.broadcast %113 : vector<1x1xf32> to vector<1x32xf32>
    %115 = arith.subf %107, %114 : vector<1x32xf32>
    %116 = arith.mulf %115, %115 : vector<1x32xf32>
    %cst_40 = arith.constant dense<0.000000e+00> : vector<1xf32>
    %117 = vector.multi_reduction <add>, %116, %cst_40 [1] : vector<1x32xf32> to vector<1xf32>
    %118 = vector.shape_cast %117 : vector<1xf32> to vector<1x1xf32>
    %cst_41 = arith.constant 3.200000e+01 : f32
    %119 = vector.broadcast %cst_41 : f32 to vector<1x1xf32>
    %120 = arith.divf %118, %119 : vector<1x1xf32>
    %121 = vector.broadcast %113 : vector<1x1xf32> to vector<1x32xf32>
    %122 = arith.subf %107, %121 : vector<1x32xf32>
    %cst_42 = arith.constant 9.99999996E-13 : f32
    %123 = vector.broadcast %cst_42 : f32 to vector<1x1xf32>
    %124 = arith.addf %120, %123 : vector<1x1xf32>
    %125 = math.rsqrt %124 : vector<1x1xf32>
    %126 = vector.broadcast %125 : vector<1x1xf32> to vector<1x32xf32>
    %127 = arith.mulf %122, %126 : vector<1x32xf32>
    %128 = arith.mulf %127, %108 : vector<1x32xf32>
    %129 = arith.addf %128, %109 : vector<1x32xf32>
    %130 = arith.truncf %129 : vector<1x32xf32> to vector<1x32xbf16>
    %c0_43 = arith.constant 0 : index
    %c0_44 = arith.constant 0 : index
    %131 = vector.load %arg9[%c0_43, %c0_44] : memref<32x64xbf16, #tpu.memory_space<vmem>>, vector<32x64xbf16>
    %cst_45 = arith.constant dense<0.000000e+00> : vector<1x64xf32>
    %132 = tpu.matmul %130, %131, %cst_45 {dimension_numbers = #tpu.dot_dimension_numbers<[1], [0], [0], [1], [0, 0, 1, 1], [], []>} : vector<1x32xbf16>, vector<32x64xbf16>, vector<1x64xf32> -> vector<1x64xf32>
    %c0_46 = arith.constant 0 : index
    %c0_47 = arith.constant 0 : index
    %133 = vector.load %arg10[%c0_46, %c0_47] : memref<1x64xf32, #tpu.memory_space<vmem>>, vector<1x64xf32>
    %134 = arith.addf %132, %133 : vector<1x64xf32>
    %cst_48 = arith.constant 5.000000e-01 : f32
    %135 = vector.broadcast %cst_48 : f32 to vector<1x64xf32>
    %136 = arith.mulf %135, %134 : vector<1x64xf32>
    %cst_49 = arith.constant 0.707106769 : f32
    %137 = vector.broadcast %cst_49 : f32 to vector<1x64xf32>
    %138 = arith.mulf %134, %137 : vector<1x64xf32>
    %139 = math.absf %138 : vector<1x64xf32>
    %cst_50 = arith.constant 0.327591091 : f32
    %140 = vector.broadcast %cst_50 : f32 to vector<1x64xf32>
    %141 = arith.mulf %140, %139 : vector<1x64xf32>
    %cst_51 = arith.constant 1.000000e+00 : f32
    %142 = vector.broadcast %cst_51 : f32 to vector<1x64xf32>
    %143 = arith.addf %142, %141 : vector<1x64xf32>
    %cst_52 = arith.constant 1.000000e+00 : f32
    %144 = vector.broadcast %cst_52 : f32 to vector<1x64xf32>
    %145 = arith.divf %144, %143 : vector<1x64xf32>
    %cst_53 = arith.constant 1.06140542 : f32
    %146 = vector.broadcast %cst_53 : f32 to vector<1x64xf32>
    %147 = arith.mulf %146, %145 : vector<1x64xf32>
    %cst_54 = arith.constant -1.45315206 : f32
    %148 = vector.broadcast %cst_54 : f32 to vector<1x64xf32>
    %149 = arith.addf %147, %148 : vector<1x64xf32>
    %150 = arith.mulf %149, %145 : vector<1x64xf32>
    %cst_55 = arith.constant 1.42141378 : f32
    %151 = vector.broadcast %cst_55 : f32 to vector<1x64xf32>
    %152 = arith.addf %150, %151 : vector<1x64xf32>
    %153 = arith.mulf %152, %145 : vector<1x64xf32>
    %cst_56 = arith.constant -0.284496725 : f32
    %154 = vector.broadcast %cst_56 : f32 to vector<1x64xf32>
    %155 = arith.addf %153, %154 : vector<1x64xf32>
    %156 = arith.mulf %155, %145 : vector<1x64xf32>
    %cst_57 = arith.constant 0.254829586 : f32
    %157 = vector.broadcast %cst_57 : f32 to vector<1x64xf32>
    %158 = arith.addf %156, %157 : vector<1x64xf32>
    %159 = arith.mulf %158, %145 : vector<1x64xf32>
    %cst_58 = arith.constant 0.000000e+00 : f32
    %160 = vector.broadcast %cst_58 : f32 to vector<1x64xf32>
    %161 = arith.subf %160, %139 : vector<1x64xf32>
    %162 = arith.mulf %161, %139 : vector<1x64xf32>
    %163 = math.exp %162 : vector<1x64xf32>
    %164 = arith.mulf %159, %163 : vector<1x64xf32>
    %cst_59 = arith.constant 1.000000e+00 : f32
    %165 = vector.broadcast %cst_59 : f32 to vector<1x64xf32>
    %166 = arith.subf %165, %164 : vector<1x64xf32>
    %cst_60 = arith.constant 0.000000e+00 : f32
    %167 = vector.broadcast %cst_60 : f32 to vector<1x64xf32>
    %168 = arith.cmpf oge, %138, %167 : vector<1x64xf32>
    %cst_61 = arith.constant 0.000000e+00 : f32
    %169 = vector.broadcast %cst_61 : f32 to vector<1x64xf32>
    %170 = arith.subf %169, %166 : vector<1x64xf32>
    %171 = arith.select %168, %166, %170 : vector<1x64xi1>, vector<1x64xf32>
    %cst_62 = arith.constant 1.000000e+00 : f32
    %172 = vector.broadcast %cst_62 : f32 to vector<1x64xf32>
    %173 = arith.addf %172, %171 : vector<1x64xf32>
    %174 = arith.mulf %136, %173 : vector<1x64xf32>
    %175 = arith.truncf %174 : vector<1x64xf32> to vector<1x64xbf16>
    %c0_63 = arith.constant 0 : index
    %c0_64 = arith.constant 0 : index
    %176 = vector.load %arg11[%c0_63, %c0_64] : memref<64x32xbf16, #tpu.memory_space<vmem>>, vector<64x32xbf16>
    %cst_65 = arith.constant dense<0.000000e+00> : vector<1x32xf32>
    %177 = tpu.matmul %175, %176, %cst_65 {dimension_numbers = #tpu.dot_dimension_numbers<[1], [0], [0], [1], [0, 0, 1, 1], [], []>} : vector<1x64xbf16>, vector<64x32xbf16>, vector<1x32xf32> -> vector<1x32xf32>
    %c0_66 = arith.constant 0 : index
    %c0_67 = arith.constant 0 : index
    %178 = vector.load %arg12[%c0_66, %c0_67] : memref<1x32xf32, #tpu.memory_space<vmem>>, vector<1x32xf32>
    %179 = arith.addf %177, %178 : vector<1x32xf32>
    %180 = arith.addf %179, %129 : vector<1x32xf32>
    %c0_68 = arith.constant 0 : index
    %c0_69 = arith.constant 0 : index
    %181 = vector.load %arg13[%c0_68, %c0_69] : memref<1x32xf32, #tpu.memory_space<vmem>>, vector<1x32xf32>
    %c0_70 = arith.constant 0 : index
    %c0_71 = arith.constant 0 : index
    %182 = vector.load %arg14[%c0_70, %c0_71] : memref<1x32xf32, #tpu.memory_space<vmem>>, vector<1x32xf32>
    %cst_72 = arith.constant dense<0.000000e+00> : vector<1xf32>
    %183 = vector.multi_reduction <add>, %180, %cst_72 [1] : vector<1x32xf32> to vector<1xf32>
    %184 = vector.shape_cast %183 : vector<1xf32> to vector<1x1xf32>
    %cst_73 = arith.constant 3.200000e+01 : f32
    %185 = vector.broadcast %cst_73 : f32 to vector<1x1xf32>
    %186 = arith.divf %184, %185 : vector<1x1xf32>
    %187 = vector.broadcast %186 : vector<1x1xf32> to vector<1x32xf32>
    %188 = arith.subf %180, %187 : vector<1x32xf32>
    %189 = arith.mulf %188, %188 : vector<1x32xf32>
    %cst_74 = arith.constant dense<0.000000e+00> : vector<1xf32>
    %190 = vector.multi_reduction <add>, %189, %cst_74 [1] : vector<1x32xf32> to vector<1xf32>
    %191 = vector.shape_cast %190 : vector<1xf32> to vector<1x1xf32>
    %cst_75 = arith.constant 3.200000e+01 : f32
    %192 = vector.broadcast %cst_75 : f32 to vector<1x1xf32>
    %193 = arith.divf %191, %192 : vector<1x1xf32>
    %194 = vector.broadcast %186 : vector<1x1xf32> to vector<1x32xf32>
    %195 = arith.subf %180, %194 : vector<1x32xf32>
    %cst_76 = arith.constant 9.99999996E-13 : f32
    %196 = vector.broadcast %cst_76 : f32 to vector<1x1xf32>
    %197 = arith.addf %193, %196 : vector<1x1xf32>
    %198 = math.rsqrt %197 : vector<1x1xf32>
    %199 = vector.broadcast %198 : vector<1x1xf32> to vector<1x32xf32>
    %200 = arith.mulf %195, %199 : vector<1x32xf32>
    %201 = arith.mulf %200, %181 : vector<1x32xf32>
    %202 = arith.addf %201, %182 : vector<1x32xf32>
    %203 = arith.truncf %202 : vector<1x32xf32> to vector<1x32xbf16>
    %c0_77 = arith.constant 0 : index
    %c0_78 = arith.constant 0 : index
    %204 = vector.load %arg15[%c0_77, %c0_78] : memref<32x16xbf16, #tpu.memory_space<vmem>>, vector<32x16xbf16>
    %cst_79 = arith.constant dense<0.000000e+00> : vector<1x16xf32>
    %205 = tpu.matmul %203, %204, %cst_79 {dimension_numbers = #tpu.dot_dimension_numbers<[1], [0], [0], [1], [0, 0, 1, 1], [], []>} : vector<1x32xbf16>, vector<32x16xbf16>, vector<1x16xf32> -> vector<1x16xf32>
    %c0_80 = arith.constant 0 : index
    %c0_81 = arith.constant 0 : index
    %206 = vector.load %arg16[%c0_80, %c0_81] : memref<1x16xf32, #tpu.memory_space<vmem>>, vector<1x16xf32>
    %207 = arith.addf %205, %206 : vector<1x16xf32>
    %208 = arith.mulf %207, %207 : vector<1x16xf32>
    %cst_82 = arith.constant dense<0.000000e+00> : vector<1xf32>
    %209 = vector.multi_reduction <add>, %208, %cst_82 [1] : vector<1x16xf32> to vector<1xf32>
    %210 = vector.shape_cast %209 : vector<1xf32> to vector<1x1xf32>
    %211 = math.sqrt %210 : vector<1x1xf32>
    %cst_83 = arith.constant 9.99999996E-13 : f32
    %212 = vector.broadcast %cst_83 : f32 to vector<1x1xf32>
    %213 = arith.maximumf %211, %212 : vector<1x1xf32>
    %214 = tpu.reciprocal %213 : vector<1x1xf32> -> vector<1x1xf32>
    %215 = vector.broadcast %214 : vector<1x1xf32> to vector<1x16xf32>
    %216 = arith.mulf %207, %215 : vector<1x16xf32>
    %217 = vector.shape_cast %216 : vector<1x16xf32> to vector<1x1x16xf32>
    %c0_84 = arith.constant 0 : index
    %c0_85 = arith.constant 0 : index
    %c0_86 = arith.constant 0 : index
    %218 = vector.load %arg17[%c0_84, %c0_85, %c0_86] : memref<1x1x16xf32, #tpu.memory_space<vmem>>, vector<1x1x16xf32>
    tpu.vector_store %arg17[%c0_84, %c0_85, %c0_86], %217 {strides = array<i32>} : memref<1x1x16xf32, #tpu.memory_space<vmem>>, vector<1x1x16xf32>,
    return
  }
  func.func @transform_0(%arg0: i32) -> (i32, i32, i32) {
    %c0_i32 = arith.constant 0 : i32
    %c0_i32_0 = arith.constant 0 : i32
    %c0_i32_1 = arith.constant 0 : i32
    return %arg0, %c0_i32, %c0_i32_0 : i32, i32, i32
  }
  func.func @transform_1(%arg0: i32) -> (i32, i32, i32) {
    %c0_i32 = arith.constant 0 : i32
    %c0_i32_0 = arith.constant 0 : i32
    %c0_i32_1 = arith.constant 0 : i32
    return %arg0, %c0_i32, %c0_i32_0 : i32, i32, i32
  }
  func.func @transform_2(%arg0: i32) -> (i32, i32) {
    %c0_i32 = arith.constant 0 : i32
    %c0_i32_0 = arith.constant 0 : i32
    %c0_i32_1 = arith.constant 0 : i32
    return %c0_i32, %c0_i32_0 : i32, i32
  }
  func.func @transform_3(%arg0: i32) -> (i32, i32) {
    %c0_i32 = arith.constant 0 : i32
    %c0_i32_0 = arith.constant 0 : i32
    %c0_i32_1 = arith.constant 0 : i32
    return %c0_i32, %c0_i32_0 : i32, i32
  }
  func.func @transform_4(%arg0: i32) -> (i32, i32) {
    %c0_i32 = arith.constant 0 : i32
    %c0_i32_0 = arith.constant 0 : i32
    %c0_i32_1 = arith.constant 0 : i32
    return %c0_i32, %c0_i32_0 : i32, i32
  }
  func.func @transform_5(%arg0: i32) -> (i32, i32) {
    %c0_i32 = arith.constant 0 : i32
    %c0_i32_0 = arith.constant 0 : i32
    %c0_i32_1 = arith.constant 0 : i32
    return %c0_i32, %c0_i32_0 : i32, i32
  }
  func.func @transform_6(%arg0: i32) -> (i32, i32) {
    %c0_i32 = arith.constant 0 : i32
    %c0_i32_0 = arith.constant 0 : i32
    %c0_i32_1 = arith.constant 0 : i32
    return %c0_i32, %c0_i32_0 : i32, i32
  }
  func.func @transform_7(%arg0: i32) -> (i32, i32) {
    %c0_i32 = arith.constant 0 : i32
    %c0_i32_0 = arith.constant 0 : i32
    %c0_i32_1 = arith.constant 0 : i32
    return %c0_i32, %c0_i32_0 : i32, i32
  }
  func.func @transform_8(%arg0: i32) -> (i32, i32) {
    %c0_i32 = arith.constant 0 : i32
    %c0_i32_0 = arith.constant 0 : i32
    %c0_i32_1 = arith.constant 0 : i32
    return %c0_i32, %c0_i32_0 : i32, i32
  }
  func.func @transform_9(%arg0: i32) -> (i32, i32) {
    %c0_i32 = arith.constant 0 : i32
    %c0_i32_0 = arith.constant 0 : i32
    %c0_i32_1 = arith.constant 0 : i32
    return %c0_i32, %c0_i32_0 : i32, i32
  }
  func.func @transform_10(%arg0: i32) -> (i32, i32) {
    %c0_i32 = arith.constant 0 : i32
    %c0_i32_0 = arith.constant 0 : i32
    %c0_i32_1 = arith.constant 0 : i32
    return %c0_i32, %c0_i32_0 : i32, i32
  }
  func.func @transform_11(%arg0: i32) -> (i32, i32) {
    %c0_i32 = arith.constant 0 : i32
    %c0_i32_0 = arith.constant 0 : i32
    %c0_i32_1 = arith.constant 0 : i32
    return %c0_i32, %c0_i32_0 : i32, i32
  }
  func.func @transform_12(%arg0: i32) -> (i32, i32) {
    %c0_i32 = arith.constant 0 : i32
    %c0_i32_0 = arith.constant 0 : i32
    %c0_i32_1 = arith.constant 0 : i32
    return %c0_i32, %c0_i32_0 : i32, i32
  }
  func.func @transform_13(%arg0: i32) -> (i32, i32) {
    %c0_i32 = arith.constant 0 : i32
    %c0_i32_0 = arith.constant 0 : i32
    %c0_i32_1 = arith.constant 0 : i32
    return %c0_i32, %c0_i32_0 : i32, i32
  }
  func.func @transform_14(%arg0: i32) -> (i32, i32) {
    %c0_i32 = arith.constant 0 : i32
    %c0_i32_0 = arith.constant 0 : i32
    %c0_i32_1 = arith.constant 0 : i32
    return %c0_i32, %c0_i32_0 : i32, i32
  }
  func.func @transform_15(%arg0: i32) -> (i32, i32) {
    %c0_i32 = arith.constant 0 : i32
    %c0_i32_0 = arith.constant 0 : i32
    %c0_i32_1 = arith.constant 0 : i32
    return %c0_i32, %c0_i32_0 : i32, i32
  }
  func.func @transform_16(%arg0: i32) -> (i32, i32, i32) {
    %c0_i32 = arith.constant 0 : i32
    %c0_i32_0 = arith.constant 0 : i32
    %c0_i32_1 = arith.constant 0 : i32
    return %arg0, %c0_i32, %c0_i32_0 : i32, i32, i32
  }
}

</mosaic_0001>

<bundles_post_ra>
// kernel: alpro_text_encoder.2
= control target key start
LH: loop header
LB: loop body
LE: loop exit
PB: predicated region body
PF: predicated region fallthrough
CT: control target
= control target key end

     0   :  { %s2003_s27 = smov 0   ;;  %s2223_s0 = inlined_call_operand.vmem [shape: bf16[2,8,32], index: 0, kind: input, shape index: {}]   ;;  %s2224_s1 = inlined_call_operand.vmem [shape: f32[2,1,8], index: 1, kind: input, shape index: {}]   ;;  %s2225_s2 = inlined_call_operand.vmem [shape: f32[8,32], index: 2, kind: input, shape index: {}]   ;;  %s2226_s3 = inlined_call_operand.vmem [shape: f32[1,32], index: 3, kind: input, shape index: {}]   ;;  %s2227_s4 = inlined_call_operand.vmem [shape: f32[1,32], index: 4, kind: input, shape index: {}]   ;;  %s2228_s5 = inlined_call_operand.vmem [shape: f32[1,32], index: 5, kind: input, shape index: {}]   ;;  %s2229_s6 = inlined_call_operand.vmem [shape: bf16[32,96], index: 6, kind: input, shape index: {}]   ;;  %s2230_s7 = inlined_call_operand.vmem [shape: f32[1,96], index: 7, kind: input, shape index: {}]   ;;  %s2231_s8 = inlined_call_operand.vmem [shape: bf16[32,32], index: 8, kind: input, shape index: {}]   ;;  %s2232_s9 = inlined_call_operand.vmem [shape: f32[1,32], index: 9, kind: input, shape index: {}]   ;;  %s2233_s10 = inlined_call_operand.vmem [shape: f32[1,32], index: 10, kind: input, shape index: {}]   ;;  %s2234_s11 = inlined_call_operand.vmem [shape: f32[1,32], index: 11, kind: input, shape index: {}]   ;;  %s2235_s12 = inlined_call_operand.vmem [shape: bf16[32,64], index: 12, kind: input, shape index: {}]   ;;  %s2236_s13 = inlined_call_operand.vmem [shape: f32[1,64], index: 13, kind: input, shape index: {}]   ;;  %s2237_s14 = inlined_call_operand.vmem [shape: bf16[64,32], index: 14, kind: input, shape index: {}]   ;;  %s2238_s15 = inlined_call_operand.vmem [shape: f32[1,32], index: 15, kind: input, shape index: {}]   ;;  %s2239_s16 = inlined_call_operand.vmem [shape: f32[1,32], index: 16, kind: input, shape index: {}]   ;;  %s2240_s17 = inlined_call_operand.vmem [shape: f32[1,32], index: 17, kind: input, shape index: {}]   ;;  %s2241_s18 = inlined_call_operand.vmem [shape: bf16[2,8,32], index: 18, kind: output, shape index: {}]  }
   0x1   :  { %2242 = sst [smem:[#allocation2_spill]] %s2223_s0 }
   0x2   :  { %2243 = sst [smem:[#allocation3_spill]] %s2224_s1 }
   0x3   :  { %2244 = sst [smem:[#allocation4_spill]] %s2225_s2 }
   0x4 LB: > { %s1653_s28 = sadd.s32 4294967295, %s1893_s27   ;;  %p1657_p0 = scmp.ge.s32.totalorder %s1893_s27, 1  ;;  %s1893_s27 = sphi %s2003_s27, %s28_s27  }
   0x5   : > { %p519_p1 = scmp.lt.s32.totalorder %s1893_s27, 3 }
   0x7   : > { %p520_p2 = pnand %p1657_p0, %p519_p1 }
   0x8   : > { %p574_p3 = scmp.lt.s32.totalorder (!%p520_p2), %s1653_s28, 1  ;;  %s2245_s19 = sld [smem:[#allocation4_spill]] (!%p520_p2)  ;;  %v1660_v3 = vld [vmem:[%s2226_s3] ss:$0 sm:$0xff] (!%p520_p2)  ;;  %vm600_vm0 = vcmask (!%p520_p2), 261120   ;;  %v1895_v13 = vmov (!%p520_p2), 0.0  }
   0x9   : > { %523 = sbr.rel (%p520_p2) target bundleno = 4052 (0xfd4), region = 92  ;;  %s2246_s21 = sld [smem:[#allocation2_spill]] (!%p520_p2)  ;;  %v1853_v12 = vld [vmem:[%s2229_s6] sm:$0xff] (!%p520_p2)   ;;  %1732 = vmatprep.subr.bf16.mxu1 (!%p520_p2), %v1895_v13  ;;  %1746 = vmatprep.subr.bf16.mxu0 (!%p520_p2), %v1895_v13  ;;  %v1854_v14 = vld [vmem:[%s2229_s6 + $0x8] sm:$0xff] (!%p520_p2)   ;;  %vm1896_vm1 = vmmov (!%p520_p2), 0   ;;  %vm713_vm2 = vcmask (!%p520_p2), 64512  }
   0xa   : > { %1733 = vmatpush3.bf16.msra.mxu1 (!%p520_p2), %v1853_v12  ;;  %1736 = vmatprep.mubr.msk.bf16.mxu1 (!%p520_p2), %vm1896_vm1, %v1895_v13  ;;  %v1661_v19 = vld [vmem:[%s2227_s4] ss:$0 sm:$0xff] (!%p520_p2)  ;;  %s1897_s2 = smov (!%p520_p2), 96   ;;  %s1898_s23 = smov (!%p520_p2), 120   ;;  %vm777_vm3 = vcmask (!%p520_p2), 1043456   ;;  %vm1514_vm5 = vcmask (!%p520_p2), 523264  }
   0xb   : > { %1734 = vmatprep.subr.bf16.mxu1 (!%p520_p2), %v1895_v13  ;;  %1748 = vmatprep.mubr.msk.bf16.mxu0 (!%p520_p2), %vm1896_vm1, %v1895_v13  ;;  %v1662_v21 = vld [vmem:[%s2228_s5] ss:$0 sm:$0xff] (!%p520_p2)  ;;  %s1899_s24 = smov (!%p520_p2), 88   ;;  %s2247_s30 = sld [smem:[#allocation3_spill]] (!%p520_p2)  ;;  %v700_v12 = vld [vmem:[%s2231_s8 + $0x4] sm:$0xf] (!%p520_p2) }
   0xc   : > { %v1663_v25 = vld [vmem:[%s2230_s7] ss:$0 sm:$0xff] (!%p520_p2)  ;;  %s1901_s1 = smov (!%p520_p2), 64   ;;  %s1902_s20 = smov (!%p520_p2), 80   ;;  %vm1589_vm6 = vcmask (!%p520_p2), 257024  }
   0xd   : > { %s1904_s25 = smov (!%p520_p2), 48   ;;  %s1905_s26 = smov (!%p520_p2), 104  }
   0xe   : > { %v588_v0 = vld [vmem:[%s2245_s19] sm:$0xff] (!%p520_p2)  ;;  %1735 = vmatpush3.bf16.msra.mxu1 (!%p520_p2), %v1854_v14  ;;  %s1900_s19 = smov (!%p520_p2), 56   ;;  %v938_v14 = vsel (!%p520_p2), %vm777_vm3, %v700_v12, 0 }
   0xf   : > { %1740 = vmatprep.subr.bf16.mxu1 (!%p520_p2), %v1895_v13 }
  0x10   : > { %s2249_s28 = smov (!%p574_p3, %s1653_s28), 1 }
  0x11   : > { %s1658_s29 = sshll.u32 %s2249_s28, 2  ;;  %s580_s0 = scalar_lea.vmem %s2247_s30, %s2249_s28 }
  0x12   : > { %s577_s22 = scalar_lea.vmem %s2246_s21, %s1658_s29  ;;  %v2079_v39 = vld [vmem:[%s580_s0] ss:$0 sm:$0xff]  ;;  %s1903_s21 = smov 112  }
  0x13   : > { %v586_v1 = vld [vmem:[%s577_s22] sm:$0xf]  ;;  %s1906_s30 = smov 72  }
  0x14   : > { %v587_v2 = vunpack.c.l.bf16 %v586_v1 }
  0x16   : > { %v589_v4 = vadd.f32 %v588_v0, %v587_v2 }
  0x18   : > { %v597_v5 = vadd.f32 %v1660_v3, %v589_v4 }
  0x1a   : > { %v601_v6 = vsel %vm600_vm0, %v597_v5, 0.0 }
  0x1b   : > { %602 = vadd.xlane.f32.xlu0 %v601_v6 }
  0xa8   : > { %v603_v7 = vpop.xlane.xlu0 %602 }
  0xa9   : > { %v605_v8 = vmul.f32 0.03125, %v603_v7 }
  0xab   : > { %v606_v9 = vsub.f32 %v597_v5, %v605_v8 }
  0xad   : > { %v607_v10 = vmul.f32 %v606_v9, %v606_v9 }
  0xaf   : > { %v608_v11 = vsel %vm600_vm0, %v607_v10, 0.0  ;;  %v699_v10 = vld [vmem:[%s2231_s8] sm:$0xf] }
  0xb0   : > { %609 = vadd.xlane.f32.xlu0 %v608_v11  ;;  %v984_v11 = vsel %vm777_vm3, %v699_v10, 0 }
 0x13d   : > { %v610_v15 = vpop.xlane.xlu0 %609 }
 0x13e   : > { %v611_v16 = vmul.f32 0.03125, %v610_v15 }
 0x140   : > { %v612_v17 = vadd.f32 1e-12, %v611_v16 }
 0x142   : > { %1861 = vrsqrt.f32 %v612_v17 }
 0x14c   : > { %v1862_v18 = vpop.eup %1861 }
 0x14d   : > { %v614_v20 = vmul.f32 %v1862_v18, %v606_v9 }
 0x14f   : > { %v621_v22 = vmul.f32 %v1661_v19, %v614_v20 }
 0x151   : > { %v2047_v23 = vadd.f32 %v1662_v21, %v621_v22 }
 0x153   : > { %v629_v24 = vpack.c.bf16 %v2047_v23, %v2047_v23 }
 0x155   : > { %1737 = vmatmul.mubr.msk.bf16.vlgmr.msra.gmra.mrb[0].mxu1 %vm600_vm0, %v629_v24 }
 0x156   : > { %1742 = vmatprep.mubr.msk.bf16.mxu1 %vm1896_vm1, %v1895_v13 }
 0x228   : > { %v690_v26 = vpop.f32.mrb[0].mxu1 }
 0x229   : > { %v691_v27 = vadd.f32 %v1663_v25, %v690_v26  ;;  %v1738_v28 = vpop.f32.mrb[1].mxu1 }
 0x22a   : > { %v693_v29 = vpop.f32.mrb[2].mxu1 }
 0x22b   : > { %v696_v30 = vmul.f32 0.35355338, %v691_v27  ;;  %v2057_v31 = vpack.c.bf16 %v691_v27, %v691_v27  ;;  %v1739_v32 = vpop.f32.mrb[3].mxu1 }
 0x22d   : > { %v2059_v33 = vpack.c.bf16 %v696_v30, %v696_v30  ;;  %711 = vrot.lane.b32.xlu1 %v2057_v31, %s1897_s2 }
 0x22f   : > { %823 = vrot.lane.b32.xlu0 %v2059_v33, %s1898_s23 }
 0x231   : > { %825 = vrot.lane.b32.xlu1 %v2057_v31, %s1899_s24 }
 0x29f   : > { %v712_v34 = vpop.permute.xlu1 %711 }
 0x2a0   : > { %v718_v35 = vsel %vm713_vm2, %v712_v34, 0 }
 0x2a1   : > { %1741 = vmatpush3.bf16.xpose.msra.mxu1 %v718_v35  ;;  %v824_v38 = vpop.permute.xlu0 %823 }
 0x2a2   : > { %1752 = vmatprep.subr.bf16.mxu1 %v1895_v13 }
 0x2a3   : > { %v826_v36 = vpop.permute.xlu1 %825 }
 0x2a4   : > { %v831_v37 = vsel %vm713_vm2, %v826_v36, 0 }
 0x2a8   : > { %1743 = vmatmul.mubr.msk.bf16.vlgmr.msra.gmra.mrb[4].mxu1 %vm713_vm2, %v2059_v33 }
 0x2a9   : > { %1753 = vmatpush3.bf16.xpose.msra.mxu1 %v831_v37  ;;  %1754 = vmatprep.mubr.msk.bf16.mxu1 %vm1896_vm1, %v1895_v13 }
 0x2aa   : > { %1764 = vmatprep.subr.bf16.mxu1 %v1895_v13 }
 0x2b0   : > { %1755 = vmatmul.mubr.msk.bf16.vlgmr.msra.gmra.mrb[8].mxu1 %vm713_vm2, %v824_v38 }
 0x2b1   : > { %1766 = vmatprep.mubr.msk.bf16.mxu1 %vm1896_vm1, %v1895_v13  ;;  %1765 = vmatpush3.bf16.msra.mxu1 %v938_v14 }
 0x2b2   : > { %1776 = vmatprep.subr.bf16.mxu1 %v1895_v13 }
 0x37b   : > { %v754_v40 = vpop.f32.mrb[4].mxu1 }
 0x37c   : > { %v755_v41 = vadd.f32 %v2079_v39, %v754_v40  ;;  %v1744_v42 = vpop.f32.mrb[5].mxu1 }
 0x37d   : > { %v757_v43 = vpop.f32.mrb[6].mxu1 }
 0x37e   : > { %v1745_v44 = vpop.f32.mrb[7].mxu1  ;;  %v760_v45 = vsel %vm713_vm2, %v755_v41, -inf }
 0x37f   : > { %761 = vmax.xlane.f32.xlu1 %v760_v45 }
 0x383   : > { %v867_v46 = vpop.f32.mrb[8].mxu1 }
 0x384   : > { %v868_v47 = vadd.f32 %v2079_v39, %v867_v46  ;;  %v1756_v48 = vpop.f32.mrb[9].mxu1 }
 0x385   : > { %v870_v49 = vpop.f32.mrb[10].mxu1 }
 0x386   : > { %v1757_v50 = vpop.f32.mrb[11].mxu1  ;;  %v873_v51 = vsel %vm713_vm2, %v868_v47, -inf }
 0x387   : > { %874 = vmax.xlane.f32.xlu0 %v873_v51 }
 0x39d   : > { %885 = vrot.lane.b32.xlu0 %v2057_v31, %s1900_s19 }
 0x40c   : > { %v762_v52 = vpop.xlane.xlu1 %761 }
 0x40d   : > { %v763_v53 = vsub.f32 %v755_v41, %v762_v52 }
 0x40f   : > { %v764_v54 = vmul.f32 1.442695, %v763_v53 }
 0x411   : > { %1863 = vpow2.f32 %v764_v54 }
 0x414   : > { %v875_v55 = vpop.xlane.xlu0 %874 }
 0x415   : > { %v876_v56 = vsub.f32 %v868_v47, %v875_v55 }
 0x417   : > { %v877_v57 = vmul.f32 1.442695, %v876_v56 }
 0x418   : > { %v886_v4 = vpop.permute.xlu0 %885 }
 0x419   : > { %1865 = vpow2.f32 %v877_v57  ;;  %v891_v6 = vsel %vm777_vm3, %v886_v4, 0 }
 0x41b   : > { %v1864_v58 = vpop.eup %1863 }
 0x41c   : > { %v766_v59 = vsel %vm713_vm2, %v1864_v58, 0.0 }
 0x41d   : > { %767 = vadd.xlane.f32.xlu1 %v766_v59 }
 0x423   : > { %v1866_v60 = vpop.eup %1865 }
 0x424   : > { %v879_v61 = vsel %vm713_vm2, %v1866_v60, 0.0 }
 0x425   : > { %880 = vadd.xlane.f32.xlu1 %v879_v61 }
 0x436   : > { %772 = vrot.lane.b32.xlu1 %v2057_v31, %s1901_s1  ;;  %s1907_s1 = smov 40  }
 0x43a   : > { %1028 = vrot.lane.b32.xlu1 %v2057_v31, %s1902_s20 }
 0x43e   : > { %1026 = vrot.lane.b32.xlu1 %v2059_v33, %s1903_s21 }
 0x4aa   : > { %v768_v62 = vpop.xlane.xlu1 %767 }
 0x4ab   : > { %1867 = vrcp.f32 %v768_v62 }
 0x4b2   : > { %v881_v63 = vpop.xlane.xlu1 %880 }
 0x4b3   : > { %1869 = vrcp.f32 %v881_v63 }
 0x4b5   : > { %v1868_v0 = vpop.eup %1867 }
 0x4b6   : > { %v773_v1 = vpop.permute.xlu1 %772  ;;  %v770_v2 = vmul.f32 %v1868_v0, %v1864_v58 }
 0x4b7   : > { %v779_v3 = vsel %vm777_vm3, %v773_v1, 0 }
 0x4b8   : > { %1747 = vmatpush3.bf16.msra.mxu0 %v779_v3  ;;  %v771_v5 = vpack.c.bf16 %v770_v2, %v770_v2 }
 0x4b9   : > { %1758 = vmatprep.subr.bf16.mxu0 %v1895_v13 }
 0x4ba   : > { %v1029_v20 = vpop.permute.xlu1 %1028 }
 0x4bb   : > { %1749 = vmatmul.mubr.msk.bf16.vlgmr.msra.gmra.mrb[0].mxu0 %vm713_vm2, %v771_v5  ;;  %v1034_v26 = vsel %vm713_vm2, %v1029_v20, 0 }
 0x4bc   : > { %1759 = vmatpush3.bf16.msra.mxu0 %v891_v6  ;;  %1760 = vmatprep.mubr.msk.bf16.mxu0 %vm1896_vm1, %v1895_v13 }
 0x4bd   : > { %v1870_v7 = vpop.eup %1869  ;;  %1770 = vmatprep.subr.bf16.mxu0 %v1895_v13 }
 0x4be   : > { %v883_v8 = vmul.f32 %v1870_v7, %v1866_v60  ;;  %v1027_v28 = vpop.permute.xlu1 %1026  ;;  %v701_v60 = vld [vmem:[%s2231_s8 + $0x8] sm:$0xf] }
 0x4bf   : > { %v1141_v61 = vsel %vm777_vm3, %v701_v60, 0  ;;  %v1858_v60 = vld [vmem:[%s2237_s14 + $0x8] sm:$0xff]  }
 0x4c0   : > { %v884_v9 = vpack.c.bf16 %v883_v8, %v883_v8 }
 0x4c3   : > { %1761 = vmatmul.mubr.msk.bf16.vlgmr.msra.gmra.mrb[4].mxu0 %vm713_vm2, %v884_v9 }
 0x4c4   : > { %1772 = vmatprep.mubr.msk.bf16.mxu0 %vm1896_vm1, %v1895_v13  ;;  %1771 = vmatpush3.bf16.msra.mxu0 %v984_v11 }
 0x4c5   : > { %1782 = vmatprep.subr.bf16.mxu0 %v1895_v13 }
 0x58e   : > { %v815_v15 = vpop.f32.mrb[0].mxu0 }
 0x58f   : > { %v821_v16 = vpack.c.bf16 %v815_v15, %v815_v15  ;;  %v1750_v17 = vpop.f32.mrb[1].mxu0 }
 0x590   : > { %v818_v18 = vpop.f32.mrb[2].mxu0 }
 0x591   : > { %v1751_v19 = vpop.f32.mrb[3].mxu0  ;;  %1773 = vmatmul.mubr.msk.bf16.vlgmr.msra.gmra.mrb[8].mxu0 %vm713_vm2, %v821_v16 }
 0x592   : > { %1784 = vmatprep.mubr.msk.bf16.mxu0 %vm1896_vm1, %v1895_v13 }
 0x596   : > { %v927_v21 = vpop.f32.mrb[4].mxu0 }
 0x597   : > { %v933_v22 = vpack.c.bf16 %v927_v21, %v927_v21  ;;  %v1762_v24 = vpop.f32.mrb[5].mxu0 }
 0x598   : > { %v930_v25 = vpop.f32.mrb[6].mxu0 }
 0x599   : > { %v1763_v27 = vpop.f32.mrb[7].mxu0  ;;  %1767 = vmatmul.mubr.msk.bf16.vlgmr.msra.gmra.mrb[12].mxu1 %vm713_vm2, %v933_v22 }
 0x59a   : > { %1777 = vmatpush3.bf16.xpose.msra.mxu1 %v1034_v26  ;;  %1778 = vmatprep.mubr.msk.bf16.mxu1 %vm1896_vm1, %v1895_v13 }
 0x59b   : > { %1788 = vmatprep.subr.bf16.mxu1 %v1895_v13 }
 0x5a1   : > { %1779 = vmatmul.mubr.msk.bf16.vlgmr.msra.gmra.mrb[16].mxu1 %vm713_vm2, %v1027_v28 }
 0x5a2   : > { %1790 = vmatprep.mubr.msk.bf16.mxu1 %vm1896_vm1, %v1895_v13  ;;  %1789 = vmatpush3.bf16.msra.mxu1 %v1141_v61  ;;  %v1859_v61 = vld [vmem:[%s2237_s14 + $0x10] sm:$0xff]  }
 0x5a3   : > { %1800 = vmatprep.subr.bf16.mxu1 %v1895_v13 }
 0x664   : > { %v1020_v29 = vpop.f32.mrb[8].mxu0 }
 0x665   : > { %v1774_v30 = vpop.f32.mrb[9].mxu0 }
 0x666   : > { %v1023_v32 = vpop.f32.mrb[10].mxu0 }
 0x667   : > { %v1775_v34 = vpop.f32.mrb[11].mxu0 }
 0x66c   : > { %v974_v35 = vpop.f32.mrb[12].mxu1 }
 0x66d   : > { %v2122_v36 = vadd.f32 %v1020_v29, %v974_v35  ;;  %v1768_v37 = vpop.f32.mrb[13].mxu1  ;;  %v1680_v35 = vld [vmem:[%s2232_s9] ss:$0 sm:$0xff] }
 0x66e   : > { %v977_v38 = vpop.f32.mrb[14].mxu1 }
 0x66f   : > { %v1769_v40 = vpop.f32.mrb[15].mxu1 }
 0x674   : > { %v1070_v41 = vpop.f32.mrb[16].mxu1 }
 0x675   : > { %v1071_v42 = vadd.f32 %v2079_v39, %v1070_v41  ;;  %v1780_v43 = vpop.f32.mrb[17].mxu1 }
 0x676   : > { %v1073_v44 = vpop.f32.mrb[18].mxu1 }
 0x677   : > { %v1781_v45 = vpop.f32.mrb[19].mxu1  ;;  %v1076_v46 = vsel %vm713_vm2, %v1071_v42, -inf }
 0x678   : > { %1077 = vmax.xlane.f32.xlu1 %v1076_v46 }
 0x689   : > { %1088 = vrot.lane.b32.xlu1 %v2057_v31, %s1904_s25  ;;  %s584_s25 = scalar_lea.vmem %s2241_s18, %s1658_s29 }
 0x68d   : > { %1184 = vrot.lane.b32.xlu1 %v2059_v33, %s1905_s26 }
 0x705   : > { %v1078_v47 = vpop.xlane.xlu1 %1077 }
 0x706   : > { %v1079_v48 = vsub.f32 %v1071_v42, %v1078_v47 }
 0x708   : > { %v1080_v49 = vmul.f32 1.442695, %v1079_v48 }
 0x709   : > { %v1089_v50 = vpop.permute.xlu1 %1088 }
 0x70a   : > { %1871 = vpow2.f32 %v1080_v49  ;;  %v1094_v51 = vsel %vm777_vm3, %v1089_v50, 0  ;;  %v1855_v49 = vld [vmem:[%s2235_s12] sm:$0xff]   ;;  %v1856_v50 = vld [vmem:[%s2235_s12 + $0x8] sm:$0xff]  }
 0x70b   : > { %1783 = vmatpush3.bf16.msra.mxu0 %v1094_v51 }
 0x70c   : > { %1794 = vmatprep.subr.bf16.mxu0 %v1895_v13 }
 0x70d   : > { %v1185_v59 = vpop.permute.xlu1 %1184 }
 0x714   : > { %v1872_v52 = vpop.eup %1871 }
 0x715   : > { %v1082_v53 = vsel %vm713_vm2, %v1872_v52, 0.0 }
 0x716   : > { %1083 = vadd.xlane.f32.xlu0 %v1082_v53 }
 0x72c   : > { %1186 = vrot.lane.b32.xlu0 %v2057_v31, %s1906_s30 }
 0x7a3   : > { %v1084_v54 = vpop.xlane.xlu0 %1083 }
 0x7a4   : > { %1873 = vrcp.f32 %v1084_v54  ;;  %v1681_v54 = vld [vmem:[%s2233_s10] ss:$0 sm:$0xff] }
 0x7a7   : > { %v1187_v56 = vpop.permute.xlu0 %1186 }
 0x7a8   : > { %v1192_v58 = vsel %vm713_vm2, %v1187_v56, 0 }
 0x7ae   : > { %v1874_v33 = vpop.eup %1873 }
 0x7af   : > { %v1086_v55 = vmul.f32 %v1874_v33, %v1872_v52 }
 0x7b1   : > { %v1087_v57 = vpack.c.bf16 %v1086_v55, %v1086_v55  ;;  %v1682_v55 = vld [vmem:[%s2234_s11] ss:$0 sm:$0xff] }
 0x7b3   : > { %1785 = vmatmul.mubr.msk.bf16.vlgmr.msra.gmra.mrb[12].mxu0 %vm713_vm2, %v1087_v57 }
 0x7b4   : > { %1795 = vmatpush3.bf16.xpose.msra.mxu0 %v1192_v58  ;;  %1796 = vmatprep.mubr.msk.bf16.mxu0 %vm1896_vm1, %v1895_v13 }
 0x7b5   : > { %1806 = vmatprep.subr.bf16.mxu0 %v1895_v13 }
 0x7bb   : > { %1797 = vmatmul.mubr.msk.bf16.vlgmr.msra.gmra.mrb[16].mxu0 %vm713_vm2, %v1185_v59  ;;  %v1857_v59 = vld [vmem:[%s2237_s14] sm:$0xff]  }
 0x7bc   : > { %1808 = vmatprep.mubr.msk.bf16.mxu0 %vm1896_vm1, %v1895_v13 }
 0x886   : > { %v1130_v62 = vpop.f32.mrb[12].mxu0 }
 0x887   : > { %v1136_v63 = vpack.c.bf16 %v1130_v62, %v1130_v62  ;;  %v1786_v0 = vpop.f32.mrb[13].mxu0  ;;  %v1860_v62 = vld [vmem:[%s2237_s14 + $0x18] sm:$0xff]  }
 0x888   : > { %v1133_v1 = vpop.f32.mrb[14].mxu0 }
 0x889   : > { %v1787_v2 = vpop.f32.mrb[15].mxu0  ;;  %1791 = vmatmul.mubr.msk.bf16.vlgmr.msra.gmra.mrb[20].mxu1 %vm713_vm2, %v1136_v63  ;;  %v1683_v63 = vld [vmem:[%s2236_s13] ss:$0 sm:$0xff] }
 0x88a   : > { %1802 = vmatprep.mubr.msk.bf16.mxu1 %vm1896_vm1, %v1895_v13 }
 0x88e   : > { %v1228_v3 = vpop.f32.mrb[16].mxu0 }
 0x88f   : > { %v1229_v4 = vadd.f32 %v2079_v39, %v1228_v3  ;;  %v1798_v5 = vpop.f32.mrb[17].mxu0  ;;  %v702_v39 = vld [vmem:[%s2231_s8 + $0xc] sm:$0xf] }
 0x890   : > { %v1231_v6 = vpop.f32.mrb[18].mxu0  ;;  %v1299_v15 = vsel %vm777_vm3, %v702_v39, 0 }
 0x891   : > { %v1799_v7 = vpop.f32.mrb[19].mxu0  ;;  %v1234_v8 = vsel %vm713_vm2, %v1229_v4, -inf  ;;  %1807 = vmatpush3.bf16.msra.mxu0 %v1299_v15 }
 0x892   : > { %1235 = vmax.xlane.f32.xlu1 %v1234_v8  ;;  %1820 = vmatprep.subr.bf16.mxu0 %v1895_v13 }
 0x91f   : > { %v1236_v9 = vpop.xlane.xlu1 %1235 }
 0x920   : > { %v1237_v10 = vsub.f32 %v1229_v4, %v1236_v9 }
 0x922   : > { %v1238_v11 = vmul.f32 1.442695, %v1237_v10 }
 0x924   : > { %1875 = vpow2.f32 %v1238_v11 }
 0x92e   : > { %v1876_v12 = vpop.eup %1875 }
 0x92f   : > { %v1240_v14 = vsel %vm713_vm2, %v1876_v12, 0.0 }
 0x930   : > { %1241 = vadd.xlane.f32.xlu0 %v1240_v14 }
 0x946   : > { %1246 = vrot.lane.b32.xlu0 %v2057_v31, %s1907_s1 }
 0x95c   : > { %v1177_v16 = vpop.f32.mrb[20].mxu1 }
 0x95d   : > { %v1183_v17 = vadd.f32 %v1177_v16, %v2122_v36  ;;  %v1792_v18 = vpop.f32.mrb[21].mxu1 }
 0x95e   : > { %v1180_v19 = vpop.f32.mrb[22].mxu1 }
 0x95f   : > { %v1793_v20 = vpop.f32.mrb[23].mxu1 }
 0x9bd   : > { %v1242_v21 = vpop.xlane.xlu0 %1241 }
 0x9be   : > { %1877 = vrcp.f32 %v1242_v21 }
 0x9c1   : > { %v1247_v22 = vpop.permute.xlu0 %1246 }
 0x9c2   : > { %v1252_v31 = vsel %vm777_vm3, %v1247_v22, 0 }
 0x9c3   : > { %1801 = vmatpush3.bf16.msra.mxu1 %v1252_v31 }
 0x9c4   : > { %1812 = vmatprep.subr.bf16.mxu1 %v1895_v13 }
 0x9c8   : > { %v1878_v24 = vpop.eup %1877 }
 0x9c9   : > { %v1244_v25 = vmul.f32 %v1878_v24, %v1876_v12 }
 0x9cb   : > { %v1245_v26 = vpack.c.bf16 %v1244_v25, %v1244_v25 }
 0x9cd   : > { %1803 = vmatmul.mubr.msk.bf16.vlgmr.msra.gmra.mrb[24].mxu1 %vm713_vm2, %v1245_v26 }
 0x9ce   : > { %1816 = vmatprep.mubr.msk.bf16.mxu1 %vm1896_vm1, %v1895_v13  ;;  %1813 = vmatpush3.bf16.msra.mxu1 %v1855_v49 }
 0x9cf   : > { %1814 = vmatprep.subr.bf16.mxu1 %v1895_v13 }
 0x9d2   : > { %1815 = vmatpush3.bf16.msra.mxu1 %v1856_v50  ;;  %v1693_v50 = vld [vmem:[%s2239_s16] ss:$0 sm:$0xff] }
 0xaa0   : > { %v1288_v27 = vpop.f32.mrb[24].mxu1 }
 0xaa1   : > { %v1294_v28 = vpack.c.bf16 %v1288_v27, %v1288_v27  ;;  %v1804_v29 = vpop.f32.mrb[25].mxu1 }
 0xaa2   : > { %v1291_v30 = vpop.f32.mrb[26].mxu1 }
 0xaa3   : > { %v1805_v32 = vpop.f32.mrb[27].mxu1  ;;  %1809 = vmatmul.mubr.msk.bf16.vlgmr.msra.gmra.mrb[20].mxu0 %vm713_vm2, %v1294_v28  ;;  %v1687_v30 = vld [vmem:[%s2238_s15] ss:$0 sm:$0xff] }
 0xaa4   : > { %1828 = vmatprep.mubr.msk.bf16.mxu0 %vm1896_vm1, %v1895_v13  ;;  %1821 = vmatpush3.bf16.msra.mxu0 %v1857_v59 }
 0xaa5   : > { %1822 = vmatprep.subr.bf16.mxu0 %v1895_v13 }
 0xaa8   : > { %1823 = vmatpush3.bf16.msra.mxu0 %v1858_v60 }
 0xaa9   : > { %1824 = vmatprep.subr.bf16.mxu0 %v1895_v13 }
 0xaac   : > { %1825 = vmatpush3.bf16.msra.mxu0 %v1859_v61 }
 0xaad   : > { %1826 = vmatprep.subr.bf16.mxu0 %v1895_v13 }
 0xab0   : > { %1827 = vmatpush3.bf16.msra.mxu0 %v1860_v62 }
 0xb76   : > { %v1335_v34 = vpop.f32.mrb[20].mxu0 }
 0xb77   : > { %v1341_v36 = vadd.f32 %v1335_v34, %v1183_v17  ;;  %v1810_v37 = vpop.f32.mrb[21].mxu0 }
 0xb78   : > { %v1338_v38 = vpop.f32.mrb[22].mxu0 }
 0xb79   : > { %v1349_v40 = vadd.f32 %v1680_v35, %v1341_v36  ;;  %v1811_v41 = vpop.f32.mrb[23].mxu0 }
 0xb7b   : > { %v1350_v42 = vadd.f32 %v1349_v40, %v2047_v23 }
 0xb7d   : > { %v1353_v43 = vsel %vm600_vm0, %v1350_v42, 0.0 }
 0xb7e   : > { %1354 = vadd.xlane.f32.xlu1 %v1353_v43 }
 0xc0b   : > { %v1355_v44 = vpop.xlane.xlu1 %1354 }
 0xc0c   : > { %v1356_v45 = vmul.f32 0.03125, %v1355_v44 }
 0xc0e   : > { %v1357_v46 = vsub.f32 %v1350_v42, %v1356_v45 }
 0xc10   : > { %v1358_v47 = vmul.f32 %v1357_v46, %v1357_v46 }
 0xc12   : > { %v1359_v48 = vsel %vm600_vm0, %v1358_v47, 0.0 }
 0xc13   : > { %1360 = vadd.xlane.f32.xlu1 %v1359_v48 }
 0xca0   : > { %v1361_v23 = vpop.xlane.xlu1 %1360 }
 0xca1   : > { %v1362_v51 = vmul.f32 0.03125, %v1361_v23 }
 0xca3   : > { %v1363_v52 = vadd.f32 1e-12, %v1362_v51  ;;  %v1694_v51 = vld [vmem:[%s2240_s17] ss:$0 sm:$0xff] }
 0xca5   : > { %1879 = vrsqrt.f32 %v1363_v52 }
 0xcaf   : > { %v1880_v53 = vpop.eup %1879 }
 0xcb0   : > { %v1365_v33 = vmul.f32 %v1880_v53, %v1357_v46 }
 0xcb2   : > { %v1372_v56 = vmul.f32 %v1681_v54, %v1365_v33 }
 0xcb4   : > { %v1379_v57 = vadd.f32 %v1682_v55, %v1372_v56 }
 0xcb6   : > { %v1380_v58 = vpack.c.bf16 %v1379_v57, %v1379_v57 }
 0xcb8   : > { %1817 = vmatmul.mubr.msk.bf16.vlgmr.msra.gmra.mrb[28].mxu1 %vm600_vm0, %v1380_v58 }
 0xd8b   : > { %v1441_v0 = vpop.f32.mrb[28].mxu1 }
 0xd8c   : > { %v1442_v1 = vadd.f32 %v1683_v63, %v1441_v0  ;;  %v1818_v2 = vpop.f32.mrb[29].mxu1 }
 0xd8d   : > { %v1444_v3 = vpop.f32.mrb[30].mxu1 }
 0xd8e   : > { %v1448_v4 = vmul.f32 0.70710677, %v1442_v1  ;;  %v1819_v5 = vpop.f32.mrb[31].mxu1  ;;  %v1447_v26 = vmul.f32 0.5, %v1442_v1 }
 0xd90   : > { %v1449_v6 = vand.u32 2147483647, %v1448_v4  ;;  %vm1469_vm4 = vcmp.ge.f32.partialorder %v1448_v4, 0.0 }
 0xd92   : > { %v1450_v7 = vmul.f32 0.3275911, %v1449_v6  ;;  %v1463_v13 = vsub.f32 0.0, %v1449_v6 }
 0xd94   : > { %v1451_v8 = vadd.f32 1.0, %v1450_v7  ;;  %v1464_v10 = vmul.f32 %v1463_v13, %v1449_v6 }
 0xd96   : > { %1881 = vrcp.f32 %v1451_v8  ;;  %v1465_v14 = vmul.f32 1.442695, %v1464_v10 }
 0xd98   : > { %1883 = vpow2.f32 %v1465_v14 }
 0xda0   : > { %v1882_v9 = vpop.eup %1881 }
 0xda1   : > { %v1454_v11 = vmul.f32 1.0614054, %v1882_v9 }
 0xda2   : > { %v1884_v21 = vpop.eup %1883 }
 0xda3   : > { %v1455_v12 = vadd.f32 -1.4531521, %v1454_v11 }
 0xda5   : > { %v1456_v39 = vmul.f32 %v1882_v9, %v1455_v12 }
 0xda7   : > { %v1457_v15 = vadd.f32 1.4214138, %v1456_v39 }
 0xda9   : > { %v1458_v16 = vmul.f32 %v1882_v9, %v1457_v15 }
 0xdab   : > { %v1459_v17 = vadd.f32 -0.28449672, %v1458_v16 }
 0xdad   : > { %v1460_v18 = vmul.f32 %v1882_v9, %v1459_v17 }
 0xdaf   : > { %v1461_v19 = vadd.f32 0.2548296, %v1460_v18 }
 0xdb1   : > { %v1462_v20 = vmul.f32 %v1882_v9, %v1461_v19 }
 0xdb3   : > { %v1467_v22 = vmul.f32 %v1884_v21, %v1462_v20 }
 0xdb5   : > { %v1468_v31 = vsub.f32 1.0, %v1467_v22 }
 0xdb7   : > { %v1470_v24 = vsub.f32 0.0, %v1468_v31 }
 0xdb9   : > { %v1471_v25 = vsel %vm1469_vm4, %v1468_v31, %v1470_v24 }
 0xdba   : > { %v1472_v27 = vadd.f32 1.0, %v1471_v25 }
 0xdbc   : > { %v1473_v28 = vmul.f32 %v1472_v27, %v1447_v26 }
 0xdbe   : > { %v1474_v29 = vpack.c.bf16 %v1473_v28, %v1473_v28 }
 0xdc0   : > { %1829 = vmatmul.mubr.msk.bf16.vlgmr.msra.gmra.mrb[24].mxu0 %vm1514_vm5, %v1474_v29 }
 0xe93   : > { %v1552_v32 = vpop.f32.mrb[24].mxu0 }
 0xe94   : > { %v1553_v34 = vadd.f32 %v1687_v30, %v1552_v32  ;;  %v1830_v35 = vpop.f32.mrb[25].mxu0 }
 0xe95   : > { %v1555_v36 = vpop.f32.mrb[26].mxu0 }
 0xe96   : > { %v1831_v37 = vpop.f32.mrb[27].mxu0  ;;  %v1558_v38 = vadd.f32 %v1553_v34, %v1379_v57 }
 0xe98   : > { %v1561_v40 = vsel %vm600_vm0, %v1558_v38, 0.0 }
 0xe99   : > { %1562 = vadd.xlane.f32.xlu1 %v1561_v40 }
 0xf26   : > { %v1563_v41 = vpop.xlane.xlu1 %1562 }
 0xf27   : > { %v1564_v42 = vmul.f32 0.03125, %v1563_v41 }
 0xf29   : > { %v1565_v43 = vsub.f32 %v1558_v38, %v1564_v42 }
 0xf2b   : > { %v1566_v44 = vmul.f32 %v1565_v43, %v1565_v43 }
 0xf2d   : > { %v1567_v45 = vsel %vm600_vm0, %v1566_v44, 0.0 }
 0xf2e   : > { %1568 = vadd.xlane.f32.xlu1 %v1567_v45 }
 0xfbb   : > { %v1569_v46 = vpop.xlane.xlu1 %1568 }
 0xfbc   : > { %v1570_v47 = vmul.f32 0.03125, %v1569_v46 }
 0xfbe   : > { %v1571_v48 = vadd.f32 1e-12, %v1570_v47 }
 0xfc0   : > { %1885 = vrsqrt.f32 %v1571_v48 }
 0xfca   : > { %v1886_v49 = vpop.eup %1885 }
 0xfcb   : > { %v1573_v23 = vmul.f32 %v1886_v49, %v1565_v43 }
 0xfcd   : > { %v1580_v52 = vmul.f32 %v1693_v50, %v1573_v23 }
 0xfcf   : > { %v1587_v53 = vadd.f32 %v1694_v51, %v1580_v52 }
 0xfd1   : > { %v1588_v54 = vpack.c.bf16 %v1587_v53, %v1587_v53 }
 0xfd3   : > { %1590 = vst.msk [vmem:[%s584_s25] sm:$0xf] %vm1589_vm6, %v1588_v54 }
 0xfd4 PF: > { %s28_s27 = sadd.s32 1, %s1893_s27  }
 0xfd5   : > { %p25_p4 = scmp.ge.s32.totalorder %s28_s27, 4  }
 0xfd7   :  { %27 = sbr.rel (!%p25_p4) target bundleno = 4 (0x4), region = 125 }

// kernel: alpro_text_encoder.3
= control target key start
LH: loop header
LB: loop body
LE: loop exit
PB: predicated region body
PF: predicated region fallthrough
CT: control target
= control target key end

     0   :  { %s2335_s0 = inlined_call_operand.vmem [shape: bf16[2,8,32], index: 0, kind: input, shape index: {}]   ;;  %s2336_s1 = inlined_call_operand.vmem [shape: f32[2,1,8], index: 1, kind: input, shape index: {}]   ;;  %s2337_s2 = inlined_call_operand.vmem [shape: bf16[32,96], index: 2, kind: input, shape index: {}]   ;;  %s2338_s3 = inlined_call_operand.vmem [shape: f32[1,96], index: 3, kind: input, shape index: {}]   ;;  %s2339_s4 = inlined_call_operand.vmem [shape: bf16[32,32], index: 4, kind: input, shape index: {}]   ;;  %s2340_s5 = inlined_call_operand.vmem [shape: f32[1,32], index: 5, kind: input, shape index: {}]   ;;  %s2341_s6 = inlined_call_operand.vmem [shape: f32[1,32], index: 6, kind: input, shape index: {}]   ;;  %s2342_s7 = inlined_call_operand.vmem [shape: f32[1,32], index: 7, kind: input, shape index: {}]   ;;  %s2343_s8 = inlined_call_operand.vmem [shape: bf16[32,64], index: 8, kind: input, shape index: {}]   ;;  %s2344_s9 = inlined_call_operand.vmem [shape: f32[1,64], index: 9, kind: input, shape index: {}]   ;;  %s2345_s10 = inlined_call_operand.vmem [shape: bf16[64,32], index: 10, kind: input, shape index: {}]   ;;  %s2346_s11 = inlined_call_operand.vmem [shape: f32[1,32], index: 11, kind: input, shape index: {}]   ;;  %s2347_s12 = inlined_call_operand.vmem [shape: f32[1,32], index: 12, kind: input, shape index: {}]   ;;  %s2348_s13 = inlined_call_operand.vmem [shape: f32[1,32], index: 13, kind: input, shape index: {}]   ;;  %s2349_s14 = inlined_call_operand.vmem [shape: bf16[32,16], index: 14, kind: input, shape index: {}]   ;;  %s2350_s15 = inlined_call_operand.vmem [shape: f32[1,16], index: 15, kind: input, shape index: {}]   ;;  %s2351_s16 = inlined_call_operand.hbm [shape: f32[2,1,16], index: 16, kind: output, shape index: {}]  }
   0x1   :  { %2352 = sst [smem:[#allocation6_spill]] %s2335_s0 }
   0x2   :  { %2353 = sst [smem:[#allocation7_spill]] %s2336_s1 }
   0x3   :  { %2354 = sst [smem:[#allocation8_spill]] %s2337_s2 }
   0x4   :  { %2355 = sst [smem:[#allocation9_spill]] %s2338_s3 }
   0x5   :  { %2356 = sst [smem:[#allocation10_spill]] %s2339_s4 }
   0x6   :  { %21 = vsyncpa [#allocation3], 0 }
   0x7   :  { %23 = vsyncpa [#allocation3 + $0x1], 0  ;;  %s2035_s21 = smov 0   ;;  %s2037_s22 = smov 0  }
   0x8   :  { %s2039_s23 = smov 0   ;;  %s2041_s24 = smov 0  }
   0x9 LB: > { %s2056_s25 = sadd.s32 4294967295, %s1934_s24   ;;  %s1601_s26 = sadd.s32 4294967294, %s1934_s24   ;;  %s1934_s24 = sphi %s2041_s24, %s2369_s24   ;;  %s1930_s23 = sphi %s2039_s23, %s2368_s23   ;;  %s1926_s22 = sphi %s2037_s22, %s2367_s22   ;;  %s1922_s21 = sphi %s2035_s21, %s2366_s21  }
   0xa   : > { %s2060_s27 = sadd.s32 1, %s1934_s24   ;;  %s382_s28 = sadd.s32 1, %s1930_s23 }
   0xb   : > { %s379_s29 = ssub.s32 %s1934_s24, %s2060_s27  ;;  %p392_p0 = scmp.ne.s32.totalorder %s1930_s23, %s1926_s22 }
   0xc   : > { %p380_p1 = scmp.eq.s32.totalorder %s379_s29, 0  ;;  %p393_p2 = scmp.eq.s32.totalorder %s2056_s25, 1 }
   0xd   : > { %p398_p3 = scmp.ne.s32.totalorder %s1926_s22, %s1922_s21  ;;  %p399_p4 = scmp.eq.s32.totalorder %s1601_s26, 1 }
   0xe   : > { %s2071_s30 = scalar_select %p380_p1, %s1930_s23, %s382_s28  }
   0xf   : > { %p2073_p5 = por %p393_p2, %p392_p0  ;;  %p2077_p6 = por %p399_p4, %p398_p3 }
  0x10   : > { %2357 = sst [smem:[#allocation5_spill]] %s2071_s30  ;;  %p1604_p7 = scmp.ge.s32.totalorder %s1934_s24, 1 }
  0x11   : > { %p472_p8 = scmp.lt.s32.totalorder %s1934_s24, 3 }
  0x13   : > { %p473_p9 = pnand %p1604_p7, %p472_p8 }
  0x14   : > { %s2360_s2 = sld [smem:[#allocation8_spill]] (!%p473_p9)  ;;  %v1936_v1 = vmov (!%p473_p9), 0.0   ;;  %vm1937_vm0 = vmmov (!%p473_p9), 0   ;;  %p523_p10 = scmp.lt.s32.totalorder (!%p473_p9), %s2056_s25, 1  ;;  %vm556_vm1 = vcmask (!%p473_p9), 261120   ;;  %vm611_vm2 = vcmask (!%p473_p9), 64512  }
  0x15   : > { %476 = sbr.rel (%p473_p9) target bundleno = 4146 (0x1032), region = 84  ;;  %1674 = vmatprep.subr.bf16.mxu0 (!%p473_p9), %v1936_v1  ;;  %1682 = vmatprep.subr.bf16.mxu1 (!%p473_p9), %v1936_v1  ;;  %s2361_s20 = sld [smem:[#allocation6_spill]] (!%p473_p9)  ;;  %vm658_vm3 = vcmask (!%p473_p9), 57344   ;;  %vm676_vm4 = vcmask (!%p473_p9), 1043456   ;;  %vm1246_vm5 = vcmask (!%p473_p9), 253952   ;;  %vm1385_vm7 = vcmask (!%p473_p9), 523264  }
  0x16   : > { %1678 = vmatprep.mubr.msk.bf16.mxu0 (!%p473_p9), %vm1937_vm0, %v1936_v1  ;;  %1684 = vmatprep.mubr.msk.bf16.mxu1 (!%p473_p9), %vm1937_vm0, %v1936_v1  ;;  %s2362_s3 = sld [smem:[#allocation9_spill]] (!%p473_p9)  ;;  %s1939_s18 = smov (!%p473_p9), 120   ;;  %vm1509_vm8 = vcmask (!%p473_p9), 122880  }
  0x17   : > { %s1940_s19 = smov (!%p473_p9), 88   ;;  %s2363_s1 = sld [smem:[#allocation7_spill]] (!%p473_p9) }
  0x18   : > { %s2364_s4 = sld [smem:[#allocation10_spill]] (!%p473_p9) }
  0x1a   : > { %v1834_v0 = vld [vmem:[%s2360_s2] sm:$0xff] (!%p473_p9)   ;;  %v1835_v2 = vld [vmem:[%s2360_s2 + $0x8] sm:$0xff] (!%p473_p9)   ;;  %s1948_s2 = smov (!%p473_p9), 40  }
  0x1b   : > { %1675 = vmatpush3.bf16.msra.mxu0 (!%p473_p9), %v1834_v0 }
  0x1c   : > { %1676 = vmatprep.subr.bf16.mxu0 %v1936_v1  ;;  %s2098_s28 = scalar_select %p523_p10, %s2056_s25, 1  ;;  %v1606_v4 = vld [vmem:[%s2362_s3] ss:$0 sm:$0xff] }
  0x1e   : > { %s1605_s29 = sshll.u32 %s2098_s28, 2  ;;  %v603_v53 = vld [vmem:[%s2364_s4] sm:$0xf]  ;;  %v604_v55 = vld [vmem:[%s2364_s4 + $0x4] sm:$0xf] }
  0x1f   : > { %1677 = vmatpush3.bf16.msra.mxu0 %v1835_v2  ;;  %s526_s26 = scalar_lea.vmem %s2361_s20, %s1605_s29  ;;  %s1938_s29 = smov 96   ;;  %v883_v54 = vsel %vm676_vm4, %v603_v53, 0  ;;  %v837_v56 = vsel %vm676_vm4, %v604_v55, 0 }
  0x20   : > { %1688 = vmatprep.subr.bf16.mxu0 %v1936_v1  ;;  %v2105_v3 = vld [vmem:[%s526_s26] sm:$0xf]  ;;  %s529_s20 = scalar_lea.vmem %s2363_s1, %s2098_s28  ;;  %s1941_s28 = smov 64  }
  0x21   : > { %v2136_v18 = vld [vmem:[%s529_s20] sm:$0x1]  ;;  %s1942_s26 = smov 56  }
  0x22   : > { %1679 = vmatmul.mubr.msk.bf16.vlgmr.msra.gmra.mrb[0].mxu0 %vm556_vm1, %v2105_v3 }
  0x23   : > { %1690 = vmatprep.mubr.msk.bf16.mxu0 %vm1937_vm0, %v1936_v1 }
  0xf5   : > { %v594_v5 = vpop.f32.mrb[0].mxu0 }
  0xf6   : > { %v595_v6 = vadd.f32 %v1606_v4, %v594_v5  ;;  %v1680_v7 = vpop.f32.mrb[1].mxu0 }
  0xf7   : > { %v597_v8 = vpop.f32.mrb[2].mxu0 }
  0xf8   : > { %v600_v9 = vmul.f32 0.35355338, %v595_v6  ;;  %v2114_v10 = vpack.c.bf16 %v595_v6, %v595_v6  ;;  %v1681_v11 = vpop.f32.mrb[3].mxu0 }
  0xfa   : > { %v2116_v12 = vpack.c.bf16 %v600_v9, %v600_v9  ;;  %609 = vrot.lane.b32.xlu0 %v2114_v10, %s1938_s29  ;;  %s1943_s29 = smov 112  }
  0xfc   : > { %722 = vrot.lane.b32.xlu1 %v2116_v12, %s1939_s18  ;;  %s1944_s18 = smov 80  }
  0xfe   : > { %724 = vrot.lane.b32.xlu0 %v2114_v10, %s1940_s19 }
 0x16c   : > { %v610_v13 = vpop.permute.xlu0 %609 }
 0x16d   : > { %v616_v14 = vsel %vm611_vm2, %v610_v13, 0 }
 0x16e   : > { %1683 = vmatpush3.bf16.xpose.msra.mxu1 %v616_v14  ;;  %v723_v17 = vpop.permute.xlu1 %722 }
 0x16f   : > { %1694 = vmatprep.subr.bf16.mxu1 %v1936_v1 }
 0x170   : > { %v725_v15 = vpop.permute.xlu0 %724 }
 0x171   : > { %v730_v16 = vsel %vm611_vm2, %v725_v15, 0 }
 0x175   : > { %1685 = vmatmul.mubr.msk.bf16.vlgmr.msra.gmra.mrb[0].mxu1 %vm611_vm2, %v2116_v12 }
 0x176   : > { %1695 = vmatpush3.bf16.xpose.msra.mxu1 %v730_v16  ;;  %1696 = vmatprep.mubr.msk.bf16.mxu1 %vm1937_vm0, %v1936_v1 }
 0x177   : > { %1706 = vmatprep.subr.bf16.mxu1 %v1936_v1 }
 0x17d   : > { %1697 = vmatmul.mubr.msk.bf16.vlgmr.msra.gmra.mrb[4].mxu1 %vm611_vm2, %v723_v17 }
 0x17e   : > { %1708 = vmatprep.mubr.msk.bf16.mxu1 %vm1937_vm0, %v1936_v1  ;;  %1707 = vmatpush3.bf16.msra.mxu1 %v837_v56 }
 0x17f   : > { %1718 = vmatprep.subr.bf16.mxu1 %v1936_v1 }
 0x248   : > { %v652_v19 = vpop.f32.mrb[0].mxu1 }
 0x249   : > { %v653_v20 = vadd.f32 %v652_v19, %v2136_v18  ;;  %v1686_v21 = vpop.f32.mrb[1].mxu1 }
 0x24a   : > { %v655_v22 = vpop.f32.mrb[2].mxu1 }
 0x24b   : > { %v1687_v23 = vpop.f32.mrb[3].mxu1  ;;  %v659_v24 = vsel %vm658_vm3, %v653_v20, -inf }
 0x24c   : > { %660 = vmax.xlane.f32.xlu1 %v659_v24 }
 0x250   : > { %v766_v25 = vpop.f32.mrb[4].mxu1 }
 0x251   : > { %v767_v26 = vadd.f32 %v766_v25, %v2136_v18  ;;  %v1698_v27 = vpop.f32.mrb[5].mxu1 }
 0x252   : > { %v769_v28 = vpop.f32.mrb[6].mxu1 }
 0x253   : > { %v1699_v29 = vpop.f32.mrb[7].mxu1  ;;  %v772_v30 = vsel %vm658_vm3, %v767_v26, -inf }
 0x254   : > { %773 = vmax.xlane.f32.xlu0 %v772_v30 }
 0x2d9   : > { %v661_v31 = vpop.xlane.xlu1 %660 }
 0x2da   : > { %v662_v32 = vsub.f32 %v653_v20, %v661_v31 }
 0x2dc   : > { %v663_v33 = vmul.f32 1.442695, %v662_v32 }
 0x2de   : > { %1844 = vpow2.f32 %v663_v33 }
 0x2e1   : > { %v774_v34 = vpop.xlane.xlu0 %773 }
 0x2e2   : > { %v775_v35 = vsub.f32 %v767_v26, %v774_v34 }
 0x2e4   : > { %v776_v36 = vmul.f32 1.442695, %v775_v35 }
 0x2e6   : > { %1846 = vpow2.f32 %v776_v36 }
 0x2e8   : > { %v1845_v37 = vpop.eup %1844 }
 0x2e9   : > { %v665_v38 = vsel %vm658_vm3, %v1845_v37, 0.0 }
 0x2ea   : > { %666 = vadd.xlane.f32.xlu0 %v665_v38 }
 0x2f0   : > { %v1847_v39 = vpop.eup %1846 }
 0x2f1   : > { %v778_v40 = vsel %vm658_vm3, %v1847_v39, 0.0 }
 0x2f2   : > { %779 = vadd.xlane.f32.xlu1 %v778_v40 }
 0x300   : > { %671 = vrot.lane.b32.xlu0 %v2114_v10, %s1941_s28  ;;  %s1945_s28 = smov 72  }
 0x303   : > { %784 = vrot.lane.b32.xlu1 %v2114_v10, %s1942_s26  ;;  %s1946_s26 = smov 104  }
 0x304   : > { %925 = vrot.lane.b32.xlu0 %v2116_v12, %s1943_s29  ;;  %s1947_s29 = smov 48  }
 0x307   : > { %927 = vrot.lane.b32.xlu1 %v2114_v10, %s1944_s18 }
 0x377   : > { %v667_v41 = vpop.xlane.xlu0 %666 }
 0x378   : > { %1848 = vrcp.f32 %v667_v41 }
 0x37b   : > { %v672_v42 = vpop.permute.xlu0 %671 }
 0x37c   : > { %v678_v43 = vsel %vm676_vm4, %v672_v42, 0 }
 0x37d   : > { %1689 = vmatpush3.bf16.msra.mxu0 %v678_v43 }
 0x37e   : > { %1700 = vmatprep.subr.bf16.mxu0 %v1936_v1 }
 0x37f   : > { %v780_v44 = vpop.xlane.xlu1 %779  ;;  %v926_v7 = vpop.permute.xlu0 %925 }
 0x380   : > { %1850 = vrcp.f32 %v780_v44 }
 0x382   : > { %v1849_v45 = vpop.eup %1848 }
 0x383   : > { %v669_v46 = vmul.f32 %v1849_v45, %v1845_v37  ;;  %v785_v47 = vpop.permute.xlu1 %784 }
 0x384   : > { %v790_v49 = vsel %vm676_vm4, %v785_v47, 0 }
 0x385   : > { %v670_v48 = vpack.c.bf16 %v669_v46, %v669_v46 }
 0x387   : > { %1691 = vmatmul.mubr.msk.bf16.vlgmr.msra.gmra.mrb[4].mxu0 %vm611_vm2, %v670_v48  ;;  %v928_v62 = vpop.permute.xlu1 %927 }
 0x388   : > { %1701 = vmatpush3.bf16.msra.mxu0 %v790_v49  ;;  %1702 = vmatprep.mubr.msk.bf16.mxu0 %vm1937_vm0, %v1936_v1  ;;  %v933_v5 = vsel %vm611_vm2, %v928_v62, 0 }
 0x389   : > { %1712 = vmatprep.subr.bf16.mxu0 %v1936_v1 }
 0x38a   : > { %v1851_v50 = vpop.eup %1850 }
 0x38b   : > { %v782_v51 = vmul.f32 %v1851_v50, %v1847_v39  ;;  %v605_v39 = vld [vmem:[%s2364_s4 + $0x8] sm:$0xf] }
 0x38c   : > { %v1040_v40 = vsel %vm676_vm4, %v605_v39, 0  ;;  %v1838_v39 = vld [vmem:[%s2345_s10] sm:$0xff]  }
 0x38d   : > { %v783_v52 = vpack.c.bf16 %v782_v51, %v782_v51 }
 0x38f   : > { %1703 = vmatmul.mubr.msk.bf16.vlgmr.msra.gmra.mrb[8].mxu0 %vm611_vm2, %v783_v52 }
 0x390   : > { %1714 = vmatprep.mubr.msk.bf16.mxu0 %vm1937_vm0, %v1936_v1  ;;  %1713 = vmatpush3.bf16.msra.mxu0 %v883_v54 }
 0x391   : > { %1724 = vmatprep.subr.bf16.mxu0 %v1936_v1 }
 0x45a   : > { %v714_v57 = vpop.f32.mrb[4].mxu0 }
 0x45b   : > { %v720_v58 = vpack.c.bf16 %v714_v57, %v714_v57  ;;  %v1692_v59 = vpop.f32.mrb[5].mxu0 }
 0x45c   : > { %v717_v60 = vpop.f32.mrb[6].mxu0 }
 0x45d   : > { %v1693_v61 = vpop.f32.mrb[7].mxu0  ;;  %1715 = vmatmul.mubr.msk.bf16.vlgmr.msra.gmra.mrb[12].mxu0 %vm611_vm2, %v720_v58  ;;  %v606_v58 = vld [vmem:[%s2364_s4 + $0xc] sm:$0xf] }
 0x45e   : > { %1726 = vmatprep.mubr.msk.bf16.mxu0 %vm1937_vm0, %v1936_v1 }
 0x462   : > { %v826_v63 = vpop.f32.mrb[8].mxu0 }
 0x463   : > { %v832_v0 = vpack.c.bf16 %v826_v63, %v826_v63  ;;  %v1704_v2 = vpop.f32.mrb[9].mxu0 }
 0x464   : > { %v829_v4 = vpop.f32.mrb[10].mxu0 }
 0x465   : > { %v1705_v6 = vpop.f32.mrb[11].mxu0  ;;  %1709 = vmatmul.mubr.msk.bf16.vlgmr.msra.gmra.mrb[8].mxu1 %vm611_vm2, %v832_v0 }
 0x466   : > { %1719 = vmatpush3.bf16.xpose.msra.mxu1 %v933_v5  ;;  %1720 = vmatprep.mubr.msk.bf16.mxu1 %vm1937_vm0, %v1936_v1 }
 0x467   : > { %1730 = vmatprep.subr.bf16.mxu1 %v1936_v1 }
 0x46d   : > { %1721 = vmatmul.mubr.msk.bf16.vlgmr.msra.gmra.mrb[12].mxu1 %vm611_vm2, %v926_v7 }
 0x46e   : > { %1732 = vmatprep.mubr.msk.bf16.mxu1 %vm1937_vm0, %v1936_v1  ;;  %1731 = vmatpush3.bf16.msra.mxu1 %v1040_v40  ;;  %v1839_v40 = vld [vmem:[%s2345_s10 + $0x8] sm:$0xff]  }
 0x46f   : > { %1742 = vmatprep.subr.bf16.mxu1 %v1936_v1 }
 0x530   : > { %v919_v8 = vpop.f32.mrb[12].mxu0 }
 0x531   : > { %v1716_v9 = vpop.f32.mrb[13].mxu0 }
 0x532   : > { %v922_v11 = vpop.f32.mrb[14].mxu0 }
 0x533   : > { %v1717_v13 = vpop.f32.mrb[15].mxu0 }
 0x538   : > { %v873_v14 = vpop.f32.mrb[8].mxu1 }
 0x539   : > { %v2179_v15 = vadd.f32 %v919_v8, %v873_v14  ;;  %v1710_v16 = vpop.f32.mrb[9].mxu1  ;;  %v1241_v14 = vld [vmem:[%s2340_s5] sm:$0x1] }
 0x53a   : > { %v876_v17 = vpop.f32.mrb[10].mxu1 }
 0x53b   : > { %v1711_v19 = vpop.f32.mrb[11].mxu1  ;;  %v532_v17 = vunpack.c.l.bf16 %v2105_v3  ;;  %v1837_v3 = vld [vmem:[%s2343_s8 + $0x8] sm:$0xff]  }
 0x540   : > { %v969_v20 = vpop.f32.mrb[12].mxu1 }
 0x541   : > { %v970_v21 = vadd.f32 %v969_v20, %v2136_v18  ;;  %v1722_v22 = vpop.f32.mrb[13].mxu1 }
 0x542   : > { %v972_v23 = vpop.f32.mrb[14].mxu1 }
 0x543   : > { %v1723_v24 = vpop.f32.mrb[15].mxu1  ;;  %v975_v25 = vsel %vm658_vm3, %v970_v21, -inf }
 0x544   : > { %976 = vmax.xlane.f32.xlu1 %v975_v25 }
 0x555   : > { %1085 = vrot.lane.b32.xlu1 %v2114_v10, %s1945_s28  ;;  %s521_s28 = sand.u32 1, %s1926_s22  }
 0x556   : > { %s1525_s20 = scalar_lea.sflag [#allocation3], %s521_s28 }
 0x559   : > { %1083 = vrot.lane.b32.xlu1 %v2116_v12, %s1946_s26  ;;  %s1633_s26 = sshll.u32 %s2056_s25, 4  ;;  %s1949_s25 = smov [#allocation2]  }
 0x55a   : > { %s2292_s30 = scalar_lea.hbm %s2351_s16, %s1633_s26  ;;  %s1876_s3 = sshll.u32 %s1949_s25, 4  ;;  %s1877_s3 = int_to_ptr.vmem [resolvable:$false] %s1876_s3 }
 0x55b   : > { %s1878_s4 = scalar_lea.vmem %s1877_s3, 32 }
 0x5d1   : > { %v977_v26 = vpop.xlane.xlu1 %976 }
 0x5d2   : > { %v978_v27 = vsub.f32 %v970_v21, %v977_v26 }
 0x5d4   : > { %v979_v28 = vmul.f32 1.442695, %v978_v27 }
 0x5d5   : > { %v1086_v35 = vpop.permute.xlu1 %1085 }
 0x5d6   : > { %1852 = vpow2.f32 %v979_v28  ;;  %v1091_v37 = vsel %vm611_vm2, %v1086_v35, 0  ;;  %v1245_v35 = vld [vmem:[%s2342_s7] sm:$0x1] }
 0x5d9   : > { %v1084_v38 = vpop.permute.xlu1 %1083 }
 0x5e0   : > { %v1853_v29 = vpop.eup %1852 }
 0x5e1   : > { %v981_v30 = vsel %vm658_vm3, %v1853_v29, 0.0 }
 0x5e2   : > { %982 = vadd.xlane.f32.xlu0 %v981_v30 }
 0x5f8   : > { %987 = vrot.lane.b32.xlu0 %v2114_v10, %s1947_s29  ;;  %s522_s29 = scalar_lea.vmem [#allocation2], %s521_s28 }
 0x5f9   : > { %s1537_s18 = sshll.u32 %s522_s29, 4  ;;  %s2294_s18 = int_to_ptr.vmem [resolvable:$true] %s1537_s18 }
 0x5fa   : > { %s1872_s1 = scalar_lea.vmem %s2294_s18, 16  ;;  %p1879_p0 = scmp.lt.s32.totalorder %s2294_s18, %s1877_s3 }
 0x5fb   : > { %p1873_p11 = scmp.ne.s32.totalorder %s2294_s18, %s1872_s1  ;;  %p1880_p1 = scmp.lt.s32.totalorder %s1878_s4, %s1872_s1 }
 0x5fd   : > { %p1874_p12 = pnand %p1873_p11, %p2073_p5  ;;  %p1881_p2 = por %p1880_p1, %p1879_p0 }
 0x5ff   : > { %p1875_p13 = pneg %p1874_p12 }
 0x601   : > { %p1882_p3 = pnand %p1881_p2, %p1875_p13 }
 0x66f   : > { %v983_v31 = vpop.xlane.xlu0 %982 }
 0x670   : > { %1854 = vrcp.f32 %v983_v31 }
 0x673   : > { %v988_v32 = vpop.permute.xlu0 %987 }
 0x674   : > { %v993_v33 = vsel %vm676_vm4, %v988_v32, 0 }
 0x675   : > { %1725 = vmatpush3.bf16.msra.mxu0 %v993_v33 }
 0x676   : > { %1736 = vmatprep.subr.bf16.mxu0 %v1936_v1 }
 0x67a   : > { %v1855_v12 = vpop.eup %1854 }
 0x67b   : > { %v985_v34 = vmul.f32 %v1855_v12, %v1853_v29  ;;  %v1836_v29 = vld [vmem:[%s2343_s8] sm:$0xff]  }
 0x67c   : > { %v1244_v12 = vld [vmem:[%s2341_s6] sm:$0x1] }
 0x67d   : > { %v986_v36 = vpack.c.bf16 %v985_v34, %v985_v34 }
 0x67f   : > { %1727 = vmatmul.mubr.msk.bf16.vlgmr.msra.gmra.mrb[16].mxu0 %vm611_vm2, %v986_v36 }
 0x680   : > { %1737 = vmatpush3.bf16.xpose.msra.mxu0 %v1091_v37  ;;  %1738 = vmatprep.mubr.msk.bf16.mxu0 %vm1937_vm0, %v1936_v1 }
 0x681   : > { %1748 = vmatprep.subr.bf16.mxu0 %v1936_v1 }
 0x687   : > { %1739 = vmatmul.mubr.msk.bf16.vlgmr.msra.gmra.mrb[20].mxu0 %vm611_vm2, %v1084_v38 }
 0x688   : > { %1750 = vmatprep.mubr.msk.bf16.mxu0 %vm1937_vm0, %v1936_v1 }
 0x752   : > { %v1029_v41 = vpop.f32.mrb[16].mxu0 }
 0x753   : > { %v1035_v42 = vpack.c.bf16 %v1029_v41, %v1029_v41  ;;  %v1728_v43 = vpop.f32.mrb[17].mxu0  ;;  %v1840_v41 = vld [vmem:[%s2345_s10 + $0x10] sm:$0xff]  }
 0x754   : > { %v1032_v44 = vpop.f32.mrb[18].mxu0  ;;  %v1268_v43 = vld [vmem:[%s2344_s9] sm:$0x1] }
 0x755   : > { %v1729_v45 = vpop.f32.mrb[19].mxu0  ;;  %1733 = vmatmul.mubr.msk.bf16.vlgmr.msra.gmra.mrb[16].mxu1 %vm611_vm2, %v1035_v42  ;;  %v1841_v42 = vld [vmem:[%s2345_s10 + $0x18] sm:$0xff]  }
 0x756   : > { %1744 = vmatprep.mubr.msk.bf16.mxu1 %vm1937_vm0, %v1936_v1 }
 0x75a   : > { %v1127_v46 = vpop.f32.mrb[20].mxu0 }
 0x75b   : > { %v1128_v47 = vadd.f32 %v1127_v46, %v2136_v18  ;;  %v1740_v48 = vpop.f32.mrb[21].mxu0 }
 0x75c   : > { %v1130_v49 = vpop.f32.mrb[22].mxu0 }
 0x75d   : > { %v1741_v50 = vpop.f32.mrb[23].mxu0  ;;  %v1133_v51 = vsel %vm658_vm3, %v1128_v47, -inf }
 0x75e   : > { %1134 = vmax.xlane.f32.xlu0 %v1133_v51 }
 0x774   : > { %1145 = vrot.lane.b32.xlu0 %v2114_v10, %s1948_s2  ;;  %v1198_v10 = vsel %vm676_vm4, %v606_v58, 0 }
 0x775   : > { %1749 = vmatpush3.bf16.msra.mxu0 %v1198_v10 }
 0x776   : > { %1762 = vmatprep.subr.bf16.mxu0 %v1936_v1 }
 0x7eb   : > { %v1135_v52 = vpop.xlane.xlu0 %1134 }
 0x7ec   : > { %v1136_v53 = vsub.f32 %v1128_v47, %v1135_v52 }
 0x7ee   : > { %v1137_v54 = vmul.f32 1.442695, %v1136_v53 }
 0x7ef   : > { %v1146_v55 = vpop.permute.xlu0 %1145 }
 0x7f0   : > { %1856 = vpow2.f32 %v1137_v54  ;;  %v1151_v56 = vsel %vm676_vm4, %v1146_v55, 0 }
 0x7f1   : > { %1743 = vmatpush3.bf16.msra.mxu1 %v1151_v56 }
 0x7f2   : > { %1754 = vmatprep.subr.bf16.mxu1 %v1936_v1 }
 0x7fa   : > { %v1857_v18 = vpop.eup %1856 }
 0x7fb   : > { %v1139_v57 = vsel %vm658_vm3, %v1857_v18, 0.0 }
 0x7fc   : > { %1140 = vadd.xlane.f32.xlu1 %v1139_v57 }
 0x828   : > { %v1076_v59 = vpop.f32.mrb[16].mxu1 }
 0x829   : > { %v1082_v60 = vadd.f32 %v1076_v59, %v2179_v15  ;;  %v1734_v61 = vpop.f32.mrb[17].mxu1 }
 0x82a   : > { %v1079_v62 = vpop.f32.mrb[18].mxu1 }
 0x82b   : > { %v1735_v63 = vpop.f32.mrb[19].mxu1 }
 0x889   : > { %v1141_v0 = vpop.xlane.xlu1 %1140 }
 0x88a   : > { %1858 = vrcp.f32 %v1141_v0 }
 0x894   : > { %v1859_v2 = vpop.eup %1858 }
 0x895   : > { %v1143_v4 = vmul.f32 %v1859_v2, %v1857_v18 }
 0x897   : > { %v1144_v5 = vpack.c.bf16 %v1143_v4, %v1143_v4 }
 0x899   : > { %1745 = vmatmul.mubr.msk.bf16.vlgmr.msra.gmra.mrb[20].mxu1 %vm611_vm2, %v1144_v5 }
 0x89a   : > { %1758 = vmatprep.mubr.msk.bf16.mxu1 %vm1937_vm0, %v1936_v1  ;;  %1755 = vmatpush3.bf16.msra.mxu1 %v1836_v29 }
 0x89b   : > { %1756 = vmatprep.subr.bf16.mxu1 %v1936_v1 }
 0x89e   : > { %1757 = vmatpush3.bf16.msra.mxu1 %v1837_v3 }
 0x89f   : > { %1774 = vmatprep.subr.bf16.mxu1 %v1936_v1 }
 0x96c   : > { %v1187_v6 = vpop.f32.mrb[20].mxu1 }
 0x96d   : > { %v1193_v7 = vpack.c.bf16 %v1187_v6, %v1187_v6  ;;  %v1746_v8 = vpop.f32.mrb[21].mxu1 }
 0x96e   : > { %v1190_v9 = vpop.f32.mrb[22].mxu1 }
 0x96f   : > { %v1747_v11 = vpop.f32.mrb[23].mxu1  ;;  %1751 = vmatmul.mubr.msk.bf16.vlgmr.msra.gmra.mrb[24].mxu0 %vm611_vm2, %v1193_v7 }
 0x970   : > { %1770 = vmatprep.mubr.msk.bf16.mxu0 %vm1937_vm0, %v1936_v1  ;;  %1763 = vmatpush3.bf16.msra.mxu0 %v1838_v39 }
 0x971   : > { %1764 = vmatprep.subr.bf16.mxu0 %v1936_v1 }
 0x974   : > { %1765 = vmatpush3.bf16.msra.mxu0 %v1839_v40 }
 0x975   : > { %1766 = vmatprep.subr.bf16.mxu0 %v1936_v1 }
 0x978   : > { %1767 = vmatpush3.bf16.msra.mxu0 %v1840_v41 }
 0x979   : > { %1768 = vmatprep.subr.bf16.mxu0 %v1936_v1 }
 0x97c   : > { %1769 = vmatpush3.bf16.msra.mxu0 %v1841_v42 }
 0xa42   : > { %v1234_v13 = vpop.f32.mrb[24].mxu0 }
 0xa43   : > { %v1240_v15 = vadd.f32 %v1234_v13, %v1082_v60  ;;  %v1752_v16 = vpop.f32.mrb[25].mxu0  ;;  %v1360_v13 = vld [vmem:[%s2346_s11] sm:$0x1] }
 0xa44   : > { %v1237_v19 = vpop.f32.mrb[26].mxu0 }
 0xa45   : > { %v1242_v20 = vadd.f32 %v1241_v14, %v1240_v15  ;;  %v1753_v21 = vpop.f32.mrb[27].mxu0 }
 0xa47   : > { %v1243_v22 = vadd.f32 %v1242_v20, %v532_v17 }
 0xa49   : > { %v1247_v23 = vsel %vm1246_vm5, %v1243_v22, 0.0 }
 0xa4a   : > { %1248 = vadd.xlane.f32.xlu1 %v1247_v23 }
 0xad7   : > { %v1249_v24 = vpop.xlane.xlu1 %1248 }
 0xad8   : > { %v1251_v25 = vmul.f32 0.03125, %v1249_v24 }
 0xada   : > { %v1252_v26 = vsub.f32 %v1243_v22, %v1251_v25 }
 0xadc   : > { %v1253_v27 = vmul.f32 %v1252_v26, %v1252_v26 }
 0xade   : > { %v1254_v28 = vsel %vm1246_vm5, %v1253_v27, 0.0  ;;  %v1842_v27 = vld [vmem:[%s2349_s14] sm:$0xff]  }
 0xadf   : > { %1255 = vadd.xlane.f32.xlu1 %v1254_v28  ;;  %v1843_v28 = vld [vmem:[%s2349_s14 + $0x8] sm:$0xff]  }
 0xb6c   : > { %v1256_v30 = vpop.xlane.xlu1 %1255 }
 0xb6d   : > { %v1257_v31 = vmul.f32 0.03125, %v1256_v30 }
 0xb6f   : > { %v1258_v32 = vadd.f32 1e-12, %v1257_v31 }
 0xb71   : > { %1860 = vrsqrt.f32 %v1258_v32  ;;  %v1430_v32 = vld [vmem:[%s2347_s12] sm:$0x1] }
 0xb7b   : > { %v1861_v33 = vpop.eup %1860 }
 0xb7c   : > { %v1260_v34 = vmul.f32 %v1861_v33, %v1252_v26 }
 0xb7e   : > { %v1261_v36 = vmul.f32 %v1260_v34, %v1244_v12  ;;  %v1431_v12 = vld [vmem:[%s2348_s13] sm:$0x1] }
 0xb80   : > { %v1262_v37 = vadd.f32 %v1261_v36, %v1245_v35 }
 0xb82   : > { %v1263_v38 = vpack.c.bf16 %v1262_v37, %v1262_v37 }
 0xb84   : > { %1759 = vmatmul.mubr.msk.bf16.vlgmr.msra.gmra.mrb[24].mxu1 %vm556_vm1, %v1263_v38 }
 0xb85   : > { %1778 = vmatprep.mubr.msk.bf16.mxu1 %vm1937_vm0, %v1936_v1  ;;  %1775 = vmatpush3.bf16.msra.mxu1 %v1842_v27 }
 0xb86   : > { %1776 = vmatprep.subr.bf16.mxu1 %v1936_v1  ;;  %v1452_v1 = vld [vmem:[%s2350_s15] sm:$0x1] }
 0xb89   : > { %1777 = vmatpush3.bf16.msra.mxu1 %v1843_v28 }
 0xc57   : > { %v1318_v44 = vpop.f32.mrb[24].mxu1 }
 0xc58   : > { %v1319_v45 = vadd.f32 %v1318_v44, %v1268_v43  ;;  %v1760_v46 = vpop.f32.mrb[25].mxu1 }
 0xc59   : > { %v1321_v47 = vpop.f32.mrb[26].mxu1 }
 0xc5a   : > { %v1325_v48 = vmul.f32 0.70710677, %v1319_v45  ;;  %v1761_v49 = vpop.f32.mrb[27].mxu1  ;;  %v1324_v7 = vmul.f32 0.5, %v1319_v45 }
 0xc5c   : > { %v1326_v50 = vand.u32 2147483647, %v1325_v48  ;;  %vm1346_vm6 = vcmp.ge.f32.partialorder %v1325_v48, 0.0 }
 0xc5e   : > { %v1327_v51 = vmul.f32 0.3275911, %v1326_v50  ;;  %v1340_v53 = vsub.f32 0.0, %v1326_v50 }
 0xc60   : > { %v1328_v52 = vadd.f32 1.0, %v1327_v51  ;;  %v1341_v55 = vmul.f32 %v1340_v53, %v1326_v50 }
 0xc62   : > { %1862 = vrcp.f32 %v1328_v52  ;;  %v1342_v57 = vmul.f32 1.442695, %v1341_v55 }
 0xc64   : > { %1864 = vpow2.f32 %v1342_v57 }
 0xc6c   : > { %v1863_v54 = vpop.eup %1862 }
 0xc6d   : > { %v1331_v56 = vmul.f32 1.0614054, %v1863_v54 }
 0xc6e   : > { %v1865_v0 = vpop.eup %1864 }
 0xc6f   : > { %v1332_v18 = vadd.f32 -1.4531521, %v1331_v56 }
 0xc71   : > { %v1333_v58 = vmul.f32 %v1863_v54, %v1332_v18 }
 0xc73   : > { %v1334_v10 = vadd.f32 1.4214138, %v1333_v58 }
 0xc75   : > { %v1335_v59 = vmul.f32 %v1863_v54, %v1334_v10 }
 0xc77   : > { %v1336_v60 = vadd.f32 -0.28449672, %v1335_v59 }
 0xc79   : > { %v1337_v61 = vmul.f32 %v1863_v54, %v1336_v60 }
 0xc7b   : > { %v1338_v62 = vadd.f32 0.2548296, %v1337_v61 }
 0xc7d   : > { %v1339_v63 = vmul.f32 %v1863_v54, %v1338_v62 }
 0xc7f   : > { %v1344_v2 = vmul.f32 %v1865_v0, %v1339_v63 }
 0xc81   : > { %v1345_v4 = vsub.f32 1.0, %v1344_v2 }
 0xc83   : > { %v1347_v5 = vsub.f32 0.0, %v1345_v4 }
 0xc85   : > { %v1348_v6 = vsel %vm1346_vm6, %v1345_v4, %v1347_v5 }
 0xc86   : > { %v1349_v8 = vadd.f32 1.0, %v1348_v6 }
 0xc88   : > { %v1350_v9 = vmul.f32 %v1349_v8, %v1324_v7 }
 0xc8a   : > { %v1351_v11 = vpack.c.bf16 %v1350_v9, %v1350_v9 }
 0xc8c   : > { %1771 = vmatmul.mubr.msk.bf16.vlgmr.msra.gmra.mrb[28].mxu0 %vm1385_vm7, %v1351_v11 }
 0xd5f   : > { %v1423_v14 = vpop.f32.mrb[28].mxu0 }
 0xd60   : > { %v1424_v15 = vadd.f32 %v1423_v14, %v1360_v13  ;;  %v1772_v16 = vpop.f32.mrb[29].mxu0 }
 0xd61   : > { %v1426_v17 = vpop.f32.mrb[30].mxu0 }
 0xd62   : > { %v1773_v19 = vpop.f32.mrb[31].mxu0  ;;  %v1429_v20 = vadd.f32 %v1424_v15, %v1262_v37 }
 0xd64   : > { %v1432_v21 = vsel %vm1246_vm5, %v1429_v20, 0.0 }
 0xd65   : > { %1433 = vadd.xlane.f32.xlu1 %v1432_v21 }
 0xdf2   : > { %v1434_v22 = vpop.xlane.xlu1 %1433 }
 0xdf3   : > { %v1435_v23 = vmul.f32 0.03125, %v1434_v22 }
 0xdf5   : > { %v1436_v24 = vsub.f32 %v1429_v20, %v1435_v23 }
 0xdf7   : > { %v1437_v25 = vmul.f32 %v1436_v24, %v1436_v24 }
 0xdf9   : > { %v1438_v26 = vsel %vm1246_vm5, %v1437_v25, 0.0 }
 0xdfa   : > { %1439 = vadd.xlane.f32.xlu1 %v1438_v26 }
 0xe87   : > { %v1440_v29 = vpop.xlane.xlu1 %1439 }
 0xe88   : > { %v1441_v3 = vmul.f32 0.03125, %v1440_v29 }
 0xe8a   : > { %v1442_v30 = vadd.f32 1e-12, %v1441_v3 }
 0xe8c   : > { %1866 = vrsqrt.f32 %v1442_v30 }
 0xe96   : > { %v1867_v31 = vpop.eup %1866 }
 0xe97   : > { %v1444_v33 = vmul.f32 %v1867_v31, %v1436_v24 }
 0xe99   : > { %v1445_v34 = vmul.f32 %v1444_v33, %v1430_v32 }
 0xe9b   : > { %v1446_v35 = vadd.f32 %v1445_v34, %v1431_v12 }
 0xe9d   : > { %v1447_v36 = vpack.c.bf16 %v1446_v35, %v1446_v35 }
 0xe9f   : > { %1779 = vmatmul.mubr.msk.bf16.vlgmr.msra.gmra.mrb[28].mxu1 %vm556_vm1, %v1447_v36 }
 0xf72   : > { %v1502_v37 = vpop.f32.mrb[28].mxu1 }
 0xf73   : > { %v1503_v38 = vadd.f32 %v1502_v37, %v1452_v1  ;;  %v1780_v39 = vpop.f32.mrb[29].mxu1 }
 0xf74   : > { %v1505_v40 = vpop.f32.mrb[30].mxu1 }
 0xf75   : > { %v1781_v41 = vpop.f32.mrb[31].mxu1  ;;  %v1508_v42 = vmul.f32 %v1503_v38, %v1503_v38 }
 0xf77   : > { %v1510_v43 = vsel %vm1509_vm8, %v1508_v42, 0.0 }
 0xf78   : > { %1511 = vadd.xlane.f32.xlu1 %v1510_v43 }
0x1005   : > { %v1512_v44 = vpop.xlane.xlu1 %1511 }
0x1006   : > { %1868 = vrsqrt.f32 %v1512_v44  ;;  %vm1515_vm9 = vcmp.eq.f32.partialorder %v1512_v44, inf  ;;  %v1518_v47 = vand.u32 2147483648, %v1512_v44  ;;  %vm1517_vm10 = vcmp.eq.f32.partialorder %v1512_v44, 0.0 }
0x1010   : > { %v1869_v45 = vpop.eup %1868 }
0x1011   : > { %v1514_v46 = vmul.f32 %v1869_v45, %v1512_v44 }
0x1013   : > { %v1516_v48 = vsel %vm1515_vm9, %v1512_v44, %v1514_v46 }
0x1014   : > { %v1519_v49 = vsel %vm1517_vm10, %v1518_v47, %v1516_v48 }
0x1015   : > { %v1520_v50 = vmax.f32 %v1519_v49, 1e-12 }
0x1017   : > { %1870 = vrcp.f32 %v1520_v50 }
0x1021   : > { %v1871_v51 = vpop.eup %1870 }
0x1022   : > { %v1522_v52 = vmul.f32 %v1871_v51, %v1503_v38 }
0x1024   : > { %1523 = vst.msk [vmem:[%s522_s29] sm:$0x1] %vm1509_vm8, %v1522_v52 }
0x1025   : > { %1885 = shalt.err (!%p1882_p3)
}
0x1026   : > { %s1886_s28 = scalar_lea.hbm %s2292_s30, 16  ;;  %s1890_s19 = scalar_lea.hbm %s2351_s16, 32 }
0x1027   : > { %p1887_p4 = scmp.ne.s32.totalorder %s2292_s30, %s1886_s28  ;;  %p1891_p9 = scmp.lt.u32.totalorder %s2292_s30, %s2351_s16 }
0x1028   : > { %p1892_p10 = scmp.lt.u32.totalorder %s1890_s19, %s1886_s28  ;;  %p1894_p12 = scmp.lt.u32.totalorder %s1886_s28, %s2292_s30 }
0x1029   : > { %p1888_p7 = pnand %p1887_p4, %p2073_p5 }
0x102a   : > { %p1893_p11 = por %p1892_p10, %p1891_p9 }
0x102b   : > { %p1889_p8 = pneg %p1888_p7 }
0x102c   : > { %p1895_p13 = por %p1894_p12, %p1893_p11 }
0x102e   : > { %p1896_p0 = pnand %p1895_p13, %p1889_p8 }
0x1030   : > { %1899 = shalt.err (!%p1896_p0)
}
0x1031   : > { %1782 = dma.vmem_to_hbm [thread:$0]  (%p2073_p5), %s2294_s18, 16, %s2292_s30, %s1525_s20  }
0x1032 PF: > { %p1788_p1 = scmp.ge.s32.totalorder %s1934_s24, 2  ;;  %s1549_s1 = sand.u32 1, %s1922_s21  }
0x1033   : > { %s1550_s4 = scalar_lea.sflag [#allocation3], %s1549_s1 }
0x1034   : > { %p1785_p2 = pnand %p1788_p1, %p2077_p6 }
0x1036   : > { %1917 = dma.done.wait (!%p1785_p2), %s1550_s4, 16  }
0x1037   : > { %1919 = vsyncadd (!%p1785_p2), %s1550_s4, 4294967280  ;;  %s2365_s25 = sld [smem:[#allocation5_spill]]  ;;  %p26_p3 = scmp.ge.s32.totalorder %s2060_s27, 4  }
0x1038   : > { %s2366_s21 = smov %s1926_s22  ;;  %s2367_s22 = smov %s1930_s23 }
0x1039   : > { %s2369_s24 = smov %s2060_s27  ;;  %28 = sbr.rel (!%p26_p3) target bundleno = 9 (0x9), region = 122 }
0x103d   : > { %s2368_s23 = smov %s2365_s25 }
0x1040   :  { %1554 = vsyncpa [#allocation3], 1 }
0x1041   :  { %1556 = vsyncpa [#allocation3 + $0x1], 1 }

</bundles_post_ra>
